<compile_context>
chip_gen: v7x
topology: tpu7x:2x2x1
jax: 0.10.0
libtpu: 0.0.40
codegen_flags: <defaults>
</compile_context>

<pallas_src>
import math
import jax
import jax.numpy as jnp
from jax import lax
from jax.experimental import pallas as pl
from jax.experimental.pallas import tpu as pltpu


def make_block_kernel(N, C, num_heads, mlp_hidden, eps=1e-5, exact_softmax=False):
    head_dim = C // num_heads
    inv_sqrt2 = 1.0 / math.sqrt(2.0)
    bf16 = jnp.bfloat16

    def kernel(x_ref, g1_ref, b1_ref, wqkv_ref, wproj_ref, bproj_ref,
               g2_ref, b2_ref, wfc1_ref, bfc1_ref, wfc2_ref, bfc2_ref, o_ref):
        x = x_ref[0].astype(jnp.float32)                        # (N, C)

        # ---- LayerNorm 1 (f32 statistics) ----
        mu = jnp.mean(x, axis=-1, keepdims=True)
        var = jnp.mean((x - mu) ** 2, axis=-1, keepdims=True)
        xn = ((x - mu) * lax.rsqrt(var + eps)) * g1_ref[0] + b1_ref[0]

        # ---- Attention: qkv projection (bf16 MXU, f32 acc; qkv_bias=False).
        #      Attention scale is already folded into the Q columns of wqkv.
        qkv = jnp.dot(xn.astype(bf16), wqkv_ref[...],
                      preferred_element_type=jnp.float32)       # (N, 3C)

        # Head-batched layout: (N, 3C) -> (N, 3*nh, hd) -> (3*nh, N, hd)
        qkv = qkv.reshape(N, 3 * num_heads, head_dim)
        qkv = pltpu.einshape("nhd->hnd", qkv)                   # (3*nh, N, hd)
        q = qkv[:num_heads].astype(bf16)
        k = qkv[num_heads:2 * num_heads].astype(bf16)
        v = qkv[2 * num_heads:].astype(bf16)

        # Scores with heads as the leading batch dim (no explicit k.T transpose)
        s = jnp.einsum("hqd,hkd->hqk", q, k,
                       preferred_element_type=jnp.float32)      # (nh, N, N)
        s = s - jnp.max(s, axis=-1, keepdims=True)
        p = jnp.exp(s)
        denom = jnp.sum(p, axis=-1, keepdims=True)
        if exact_softmax:
            p = p / denom
        else:
            p = p * pl.reciprocal(denom, approx=True)

        att = jnp.einsum("hqk,hkd->hqd", p.astype(bf16), v,
                         preferred_element_type=jnp.float32)    # (nh, N, hd)

        # Projection with the head transpose folded into the weight layout:
        # wproj is (nh, hd, C) so the old XLU einshape('hnd->nhd') + relayout
        # reshape is replaced by a head-batched matmul + VPU sum over heads.
        y_h = jnp.einsum("hnd,hdc->hnc", att.astype(bf16), wproj_ref[...],
                         preferred_element_type=jnp.float32)    # (nh, N, C)
        y = jnp.sum(y_h, axis=0) + bproj_ref[0]                 # (N, C)
        x1 = x + y                                              # residual 1 (f32)

        # ---- LayerNorm 2 ----
        mu2 = jnp.mean(x1, axis=-1, keepdims=True)
        var2 = jnp.mean((x1 - mu2) ** 2, axis=-1, keepdims=True)
        xn2 = ((x1 - mu2) * lax.rsqrt(var2 + eps)) * g2_ref[0] + b2_ref[0]

        # ---- MLP: fc1 -> exact GELU (matches nn.GELU default) -> fc2 ----
        # (On v5e, if the VALU slot saturates, switch to tanh-approx GELU.)
        h = jnp.dot(xn2.astype(bf16), wfc1_ref[...],
                    preferred_element_type=jnp.float32) + bfc1_ref[0]
        h = 0.5 * h * (1.0 + lax.erf(h * inv_sqrt2))
        y2 = jnp.dot(h.astype(bf16), wfc2_ref[...],
                     preferred_element_type=jnp.float32) + bfc2_ref[0]

        o_ref[0] = (x1 + y2).astype(o_ref.dtype)                # residual 2

    return kernel


def prepare_params(params, num_heads):
    """One-time (offline) parameter prep: bf16 weight casts, attention scale
    folded into the Q columns of the qkv weight, projection weight reshaped to
    a head-major (nh, hd, C) layout."""
    bf16 = jnp.bfloat16
    C = params["wproj_t"].shape[0]
    hd = C // num_heads
    scale = jnp.asarray(hd ** (-0.5), jnp.float32)

    wqkv_t = params["wqkv_t"].astype(jnp.float32)
    wqkv_t = wqkv_t.at[:, :C].multiply(scale)        # fold q-scale into weight
    wproj_hdc = params["wproj_t"].reshape(num_heads, hd, C)

    prep = dict(params)
    prep.pop("wproj_t")
    prep["wqkv_t"] = wqkv_t.astype(bf16)
    prep["wproj_hdc"] = wproj_hdc.astype(bf16)
    prep["wfc1_t"] = params["wfc1_t"].astype(bf16)
    prep["wfc2_t"] = params["wfc2_t"].astype(bf16)
    return prep


def _vmem_limit_bytes():
    # v7x has 64 MiB VMEM per TensorCore; v5e/v6e have 128 MiB (16/32 MiB scoped
    # default).  Leave headroom on small-VMEM parts, raise the default elsewhere.
    cap = None
    try:
        cap = getattr(pltpu.get_tpu_info(), "vmem_capacity_bytes", None)
    except Exception:
        cap = None
    if cap is not None and cap <= 64 * 1024 * 1024:
        return 32 * 1024 * 1024
    return 48 * 1024 * 1024


def vit_block_forward(x, prep, num_heads, eps=1e-5):
    B, N, C = x.shape
    H = prep["wfc1_t"].shape[1]
    hd = C // num_heads
    kernel = make_block_kernel(N, C, num_heads, H, eps=eps)

    def build(single_buffer_weights):
        def full(shape):
            # Whole-array block with a constant index map (resident across the
            # grid).  Single-buffered when supported: the second pipeline
            # buffer for never-changing weights is pure VMEM waste.
            kwargs = {}
            if single_buffer_weights:
                kwargs["pipeline_mode"] = pl.Buffered(1)
            return pl.BlockSpec(shape, lambda b: (0,) * len(shape), **kwargs)

        return pl.pallas_call(
            kernel,
            out_shape=jax.ShapeDtypeStruct((B, N, C), x.dtype),
            grid_spec=pltpu.PrefetchScalarGridSpec(
                num_scalar_prefetch=0,
                grid=(B,),
                in_specs=[
                    pl.BlockSpec((1, N, C), lambda b: (b, 0, 0)),   # x
                    full((1, C)), full((1, C)),                     # ln1 gamma, beta
                    full((C, 3 * C)),                               # qkv W^T (bf16, scale folded)
                    full((num_heads, hd, C)),                       # proj W (nh, hd, C) bf16
                    full((1, C)),                                   # proj bias
                    full((1, C)), full((1, C)),                     # ln2 gamma, beta
                    full((C, H)), full((1, H)),                     # fc1 W^T (bf16), bias
                    full((H, C)), full((1, C)),                     # fc2 W^T (bf16), bias
                ],
                out_specs=pl.BlockSpec((1, N, C), lambda b: (b, 0, 0)),
            ),
            # x is fully consumed at the top of each grid step before o_ref is
            # written, so the output can reuse the input buffer.
            input_output_aliases={0: 0},
            compiler_params=pltpu.CompilerParams(
                dimension_semantics=("parallel",),
                vmem_limit_bytes=_vmem_limit_bytes(),
            ),
        )

    args = (x,
            prep["g1"], prep["b1"],
            prep["wqkv_t"],
            prep["wproj_hdc"], prep["bproj"],
            prep["g2"], prep["b2"],
            prep["wfc1_t"], prep["bfc1"],
            prep["wfc2_t"], prep["bfc2"])

    try:
        return build(single_buffer_weights=True)(*args)
    except Exception:
        # Fallback for JAX versions that reject pipeline_mode=pl.Buffered(1).
        return build(single_buffer_weights=False)(*args)


def reference_block(x, params, num_heads):
    """Pure-JAX f32 reference mirroring the PyTorch Block.forward."""
    B, N, C = x.shape
    hd = C // num_heads
    scale = hd ** (-0.5)

    def ln(z, g, b):
        mu = jnp.mean(z, -1, keepdims=True)
        var = jnp.mean((z - mu) ** 2, -1, keepdims=True)
        return (z - mu) / jnp.sqrt(var + 1e-5) * g + b

    xn = ln(x, params["g1"][0], params["b1"][0])
    qkv = xn @ params["wqkv_t"]
    qkv = qkv.reshape(B, N, 3, num_heads, hd).transpose(2, 0, 3, 1, 4)
    q, k, v = qkv[0], qkv[1], qkv[2]
    attn = jax.nn.softmax((q @ jnp.swapaxes(k, -2, -1)) * scale, axis=-1)
    att = (attn @ v).transpose(0, 2, 1, 3).reshape(B, N, C)
    x = x + att @ params["wproj_t"] + params["bproj"][0]
    xn2 = ln(x, params["g2"][0], params["b2"][0])
    h = jax.nn.gelu(xn2 @ params["wfc1_t"] + params["bfc1"][0], approximate=False)
    return x + h @ params["wfc2_t"] + params["bfc2"][0]


if __name__ == "__main__":
    B, N, C = 2, 8, 32
    num_heads = 4
    mlp_ratio = 4.0
    H = int(C * mlp_ratio)

    key = jax.random.PRNGKey(0)
    ks = jax.random.split(key, 8)
    f32 = jnp.float32

    params = {
        "g1": jnp.ones((1, C), f32),
        "b1": jnp.zeros((1, C), f32),
        # qkv: nn.Linear(C, 3C, bias=False) -> weight (3C, C); pass transposed.
        "wqkv_t": (jax.random.normal(ks[0], (3 * C, C), f32) * 0.05).T,
        "wproj_t": (jax.random.normal(ks[1], (C, C), f32) * 0.05).T,
        "bproj": jax.random.normal(ks[2], (1, C), f32) * 0.01,
        "g2": jnp.ones((1, C), f32),
        "b2": jnp.zeros((1, C), f32),
        "wfc1_t": (jax.random.normal(ks[3], (H, C), f32) * 0.05).T,
        "bfc1": jax.random.normal(ks[4], (1, H), f32) * 0.01,
        "wfc2_t": (jax.random.normal(ks[5], (C, H), f32) * 0.05).T,
        "bfc2": jax.random.normal(ks[6], (1, C), f32) * 0.01,
    }
    x = jax.random.normal(ks[7], (B, N, C), f32)

    # Compute the f32 reference before the kernel (kernel output may alias x).
    ref = reference_block(x, params, num_heads)

    prep = prepare_params(params, num_heads)
    out = vit_block_forward(x, prep, num_heads)
    out = jax.block_until_ready(out)

    assert out.shape == (B, N, C)
    # bf16 matmul operands + approx-reciprocal softmax shift numerics slightly
    # relative to the pure-f32 reference; tolerance loosened accordingly.
    # NOTE: this toy shape (N=8, C=32) is for correctness only, not benchmarking.
    assert jnp.allclose(out, ref, atol=2e-2, rtol=2e-2), float(
        jnp.max(jnp.abs(out - ref)))

    print("KERNEL_OK")
</pallas_src>

<mosaic_0001>
module attributes {stable_mosaic.version = 11 : i64} {
  func.func @kernel(%arg0: i32, %arg1: memref<1x8x32xf32, #tpu.memory_space<vmem>>, %arg2: memref<1x32xf32, #tpu.memory_space<vmem>>, %arg3: memref<1x32xf32, #tpu.memory_space<vmem>>, %arg4: memref<32x96xbf16, #tpu.memory_space<vmem>>, %arg5: memref<4x8x32xbf16, #tpu.memory_space<vmem>>, %arg6: memref<1x32xf32, #tpu.memory_space<vmem>>, %arg7: memref<1x32xf32, #tpu.memory_space<vmem>>, %arg8: memref<1x32xf32, #tpu.memory_space<vmem>>, %arg9: memref<32x128xbf16, #tpu.memory_space<vmem>>, %arg10: memref<1x128xf32, #tpu.memory_space<vmem>>, %arg11: memref<128x32xbf16, #tpu.memory_space<vmem>>, %arg12: memref<1x32xf32, #tpu.memory_space<vmem>>, %arg13: memref<1x8x32xf32, #tpu.memory_space<vmem>>) attributes {dimension_semantics = [#tpu.dimension_semantics<parallel>], iteration_bounds = array<i64: 2>, scalar_prefetch = 0 : i64, scratch_operands = 0 : i64, tpu.core_type = #tpu.core_type<tc>, window_params = [{transform_indices = @transform_0, window_bounds = array<i64: 1, 8, 32>}, {pipeline_mode = #tpu.pipeline_mode<synchronous>, transform_indices = @transform_1, window_bounds = array<i64: 1, 32>}, {pipeline_mode = #tpu.pipeline_mode<synchronous>, transform_indices = @transform_2, window_bounds = array<i64: 1, 32>}, {pipeline_mode = #tpu.pipeline_mode<synchronous>, transform_indices = @transform_3, window_bounds = array<i64: 32, 96>}, {pipeline_mode = #tpu.pipeline_mode<synchronous>, transform_indices = @transform_4, window_bounds = array<i64: 4, 8, 32>}, {pipeline_mode = #tpu.pipeline_mode<synchronous>, transform_indices = @transform_5, window_bounds = array<i64: 1, 32>}, {pipeline_mode = #tpu.pipeline_mode<synchronous>, transform_indices = @transform_6, window_bounds = array<i64: 1, 32>}, {pipeline_mode = #tpu.pipeline_mode<synchronous>, transform_indices = @transform_7, window_bounds = array<i64: 1, 32>}, {pipeline_mode = #tpu.pipeline_mode<synchronous>, transform_indices = @transform_8, window_bounds = array<i64: 32, 128>}, {pipeline_mode = #tpu.pipeline_mode<synchronous>, transform_indices = @transform_9, window_bounds = array<i64: 1, 128>}, {pipeline_mode = #tpu.pipeline_mode<synchronous>, transform_indices = @transform_10, window_bounds = array<i64: 128, 32>}, {pipeline_mode = #tpu.pipeline_mode<synchronous>, transform_indices = @transform_11, window_bounds = array<i64: 1, 32>}, {transform_indices = @transform_12, window_bounds = array<i64: 1, 8, 32>}]} {
    %c0 = arith.constant 0 : index
    %c0_0 = arith.constant 0 : index
    %c0_1 = arith.constant 0 : index
    %0 = vector.load %arg1[%c0, %c0_0, %c0_1] : memref<1x8x32xf32, #tpu.memory_space<vmem>>, vector<1x8x32xf32>
    %1 = vector.shape_cast %0 : vector<1x8x32xf32> to vector<8x32xf32>
    %cst = arith.constant dense<0.000000e+00> : vector<8xf32>
    %2 = vector.multi_reduction <add>, %1, %cst [1] : vector<8x32xf32> to vector<8xf32>
    %3 = vector.shape_cast %2 : vector<8xf32> to vector<8x1xf32>
    %cst_2 = arith.constant 3.200000e+01 : f32
    %4 = vector.broadcast %cst_2 : f32 to vector<8x1xf32>
    %5 = arith.divf %3, %4 : vector<8x1xf32>
    %6 = vector.broadcast %5 : vector<8x1xf32> to vector<8x32xf32>
    %7 = arith.subf %1, %6 : vector<8x32xf32>
    %8 = arith.mulf %7, %7 : vector<8x32xf32>
    %cst_3 = arith.constant dense<0.000000e+00> : vector<8xf32>
    %9 = vector.multi_reduction <add>, %8, %cst_3 [1] : vector<8x32xf32> to vector<8xf32>
    %10 = vector.shape_cast %9 : vector<8xf32> to vector<8x1xf32>
    %cst_4 = arith.constant 3.200000e+01 : f32
    %11 = vector.broadcast %cst_4 : f32 to vector<8x1xf32>
    %12 = arith.divf %10, %11 : vector<8x1xf32>
    %13 = vector.broadcast %5 : vector<8x1xf32> to vector<8x32xf32>
    %14 = arith.subf %1, %13 : vector<8x32xf32>
    %cst_5 = arith.constant 9.99999974E-6 : f32
    %15 = vector.broadcast %cst_5 : f32 to vector<8x1xf32>
    %16 = arith.addf %12, %15 : vector<8x1xf32>
    %17 = math.rsqrt %16 : vector<8x1xf32>
    %18 = vector.broadcast %17 : vector<8x1xf32> to vector<8x32xf32>
    %19 = arith.mulf %14, %18 : vector<8x32xf32>
    %c0_6 = arith.constant 0 : index
    %c0_7 = arith.constant 0 : index
    %20 = vector.load %arg2[%c0_6, %c0_7] : memref<1x32xf32, #tpu.memory_space<vmem>>, vector<1x32xf32>
    %21 = vector.shape_cast %20 : vector<1x32xf32> to vector<32xf32>
    %22 = vector.shape_cast %21 : vector<32xf32> to vector<1x32xf32>
    %23 = vector.broadcast %22 : vector<1x32xf32> to vector<8x32xf32>
    %24 = arith.mulf %19, %23 : vector<8x32xf32>
    %c0_8 = arith.constant 0 : index
    %c0_9 = arith.constant 0 : index
    %25 = vector.load %arg3[%c0_8, %c0_9] : memref<1x32xf32, #tpu.memory_space<vmem>>, vector<1x32xf32>
    %26 = vector.shape_cast %25 : vector<1x32xf32> to vector<32xf32>
    %27 = vector.shape_cast %26 : vector<32xf32> to vector<1x32xf32>
    %28 = vector.broadcast %27 : vector<1x32xf32> to vector<8x32xf32>
    %29 = arith.addf %24, %28 : vector<8x32xf32>
    %30 = arith.truncf %29 : vector<8x32xf32> to vector<8x32xbf16>
    %c0_10 = arith.constant 0 : index
    %c0_11 = arith.constant 0 : index
    %31 = vector.load %arg4[%c0_10, %c0_11] : memref<32x96xbf16, #tpu.memory_space<vmem>>, vector<32x96xbf16>
    %cst_12 = arith.constant dense<0.000000e+00> : vector<8x96xf32>
    %32 = tpu.matmul %30, %31, %cst_12 {dimension_numbers = #tpu.dot_dimension_numbers<[1], [0], [0], [1], [0, 0, 1, 1], [], []>} : vector<8x32xbf16>, vector<32x96xbf16>, vector<8x96xf32> -> vector<8x96xf32>
    %33 = vector.shape_cast %32 : vector<8x96xf32> to vector<8x12x8xf32>
    %34 = tpu.transpose %33, [1, 0, 2] : vector<8x12x8xf32> -> vector<12x8x8xf32>
    %35 = vector.extract_strided_slice %34 {offsets = [0, 0, 0], sizes = [4, 8, 8], strides = [1, 1, 1]} : vector<12x8x8xf32> to vector<4x8x8xf32>
    %36 = arith.truncf %35 : vector<4x8x8xf32> to vector<4x8x8xbf16>
    %37 = vector.extract_strided_slice %34 {offsets = [4, 0, 0], sizes = [4, 8, 8], strides = [1, 1, 1]} : vector<12x8x8xf32> to vector<4x8x8xf32>
    %38 = arith.truncf %37 : vector<4x8x8xf32> to vector<4x8x8xbf16>
    %39 = vector.extract_strided_slice %34 {offsets = [8, 0, 0], sizes = [4, 8, 8], strides = [1, 1, 1]} : vector<12x8x8xf32> to vector<4x8x8xf32>
    %40 = arith.truncf %39 : vector<4x8x8xf32> to vector<4x8x8xbf16>
    "tpu.trace_start"() <{level = 10 : i32, message = "hqd,hkd->hqk"}> : () -> ()
    %cst_13 = arith.constant dense<0.000000e+00> : vector<4x8x8xf32>
    %41 = tpu.matmul %36, %38, %cst_13 {dimension_numbers = #tpu.dot_dimension_numbers<[2], [2], [1], [1], [0, 0, 0, 1, 1, 1], [0], [0]>} : vector<4x8x8xbf16>, vector<4x8x8xbf16>, vector<4x8x8xf32> -> vector<4x8x8xf32>
    "tpu.trace_stop"() : () -> ()
    %cst_14 = arith.constant dense<0xFF800000> : vector<4x8xf32>
    %42 = vector.multi_reduction <maximumf>, %41, %cst_14 [2] : vector<4x8x8xf32> to vector<4x8xf32>
    %43 = vector.shape_cast %42 : vector<4x8xf32> to vector<4x8x1xf32>
    %44 = vector.broadcast %43 : vector<4x8x1xf32> to vector<4x8x8xf32>
    %45 = arith.subf %41, %44 : vector<4x8x8xf32>
    %46 = math.exp %45 : vector<4x8x8xf32>
    %cst_15 = arith.constant dense<0.000000e+00> : vector<4x8xf32>
    %47 = vector.multi_reduction <add>, %46, %cst_15 [2] : vector<4x8x8xf32> to vector<4x8xf32>
    %48 = vector.shape_cast %47 : vector<4x8xf32> to vector<4x8x1xf32>
    %49 = tpu.reciprocal %48 {approx = true} : vector<4x8x1xf32> -> vector<4x8x1xf32>
    %50 = vector.broadcast %49 : vector<4x8x1xf32> to vector<4x8x8xf32>
    %51 = arith.mulf %46, %50 : vector<4x8x8xf32>
    %52 = arith.truncf %51 : vector<4x8x8xf32> to vector<4x8x8xbf16>
    "tpu.trace_start"() <{level = 10 : i32, message = "hqk,hkd->hqd"}> : () -> ()
    %cst_16 = arith.constant dense<0.000000e+00> : vector<4x8x8xf32>
    %53 = tpu.matmul %52, %40, %cst_16 {dimension_numbers = #tpu.dot_dimension_numbers<[2], [1], [1], [2], [0, 0, 0, 1, 1, 2], [0], [0]>} : vector<4x8x8xbf16>, vector<4x8x8xbf16>, vector<4x8x8xf32> -> vector<4x8x8xf32>
    "tpu.trace_stop"() : () -> ()
    %54 = arith.truncf %53 : vector<4x8x8xf32> to vector<4x8x8xbf16>
    %c0_17 = arith.constant 0 : index
    %c0_18 = arith.constant 0 : index
    %c0_19 = arith.constant 0 : index
    %55 = vector.load %arg5[%c0_17, %c0_18, %c0_19] : memref<4x8x32xbf16, #tpu.memory_space<vmem>>, vector<4x8x32xbf16>
    "tpu.trace_start"() <{level = 10 : i32, message = "hnd,hdc->hnc"}> : () -> ()
    %cst_20 = arith.constant dense<0.000000e+00> : vector<4x8x32xf32>
    %56 = tpu.matmul %54, %55, %cst_20 {dimension_numbers = #tpu.dot_dimension_numbers<[2], [1], [1], [2], [0, 0, 0, 1, 1, 2], [0], [0]>} : vector<4x8x8xbf16>, vector<4x8x32xbf16>, vector<4x8x32xf32> -> vector<4x8x32xf32>
    "tpu.trace_stop"() : () -> ()
    %cst_21 = arith.constant dense<0.000000e+00> : vector<8x32xf32>
    %57 = vector.multi_reduction <add>, %56, %cst_21 [0] : vector<4x8x32xf32> to vector<8x32xf32>
    %c0_22 = arith.constant 0 : index
    %c0_23 = arith.constant 0 : index
    %58 = vector.load %arg6[%c0_22, %c0_23] : memref<1x32xf32, #tpu.memory_space<vmem>>, vector<1x32xf32>
    %59 = vector.shape_cast %58 : vector<1x32xf32> to vector<32xf32>
    %60 = vector.shape_cast %59 : vector<32xf32> to vector<1x32xf32>
    %61 = vector.broadcast %60 : vector<1x32xf32> to vector<8x32xf32>
    %62 = arith.addf %57, %61 : vector<8x32xf32>
    %63 = arith.addf %1, %62 : vector<8x32xf32>
    %cst_24 = arith.constant dense<0.000000e+00> : vector<8xf32>
    %64 = vector.multi_reduction <add>, %63, %cst_24 [1] : vector<8x32xf32> to vector<8xf32>
    %65 = vector.shape_cast %64 : vector<8xf32> to vector<8x1xf32>
    %cst_25 = arith.constant 3.200000e+01 : f32
    %66 = vector.broadcast %cst_25 : f32 to vector<8x1xf32>
    %67 = arith.divf %65, %66 : vector<8x1xf32>
    %68 = vector.broadcast %67 : vector<8x1xf32> to vector<8x32xf32>
    %69 = arith.subf %63, %68 : vector<8x32xf32>
    %70 = arith.mulf %69, %69 : vector<8x32xf32>
    %cst_26 = arith.constant dense<0.000000e+00> : vector<8xf32>
    %71 = vector.multi_reduction <add>, %70, %cst_26 [1] : vector<8x32xf32> to vector<8xf32>
    %72 = vector.shape_cast %71 : vector<8xf32> to vector<8x1xf32>
    %cst_27 = arith.constant 3.200000e+01 : f32
    %73 = vector.broadcast %cst_27 : f32 to vector<8x1xf32>
    %74 = arith.divf %72, %73 : vector<8x1xf32>
    %75 = vector.broadcast %67 : vector<8x1xf32> to vector<8x32xf32>
    %76 = arith.subf %63, %75 : vector<8x32xf32>
    %cst_28 = arith.constant 9.99999974E-6 : f32
    %77 = vector.broadcast %cst_28 : f32 to vector<8x1xf32>
    %78 = arith.addf %74, %77 : vector<8x1xf32>
    %79 = math.rsqrt %78 : vector<8x1xf32>
    %80 = vector.broadcast %79 : vector<8x1xf32> to vector<8x32xf32>
    %81 = arith.mulf %76, %80 : vector<8x32xf32>
    %c0_29 = arith.constant 0 : index
    %c0_30 = arith.constant 0 : index
    %82 = vector.load %arg7[%c0_29, %c0_30] : memref<1x32xf32, #tpu.memory_space<vmem>>, vector<1x32xf32>
    %83 = vector.shape_cast %82 : vector<1x32xf32> to vector<32xf32>
    %84 = vector.shape_cast %83 : vector<32xf32> to vector<1x32xf32>
    %85 = vector.broadcast %84 : vector<1x32xf32> to vector<8x32xf32>
    %86 = arith.mulf %81, %85 : vector<8x32xf32>
    %c0_31 = arith.constant 0 : index
    %c0_32 = arith.constant 0 : index
    %87 = vector.load %arg8[%c0_31, %c0_32] : memref<1x32xf32, #tpu.memory_space<vmem>>, vector<1x32xf32>
    %88 = vector.shape_cast %87 : vector<1x32xf32> to vector<32xf32>
    %89 = vector.shape_cast %88 : vector<32xf32> to vector<1x32xf32>
    %90 = vector.broadcast %89 : vector<1x32xf32> to vector<8x32xf32>
    %91 = arith.addf %86, %90 : vector<8x32xf32>
    %92 = arith.truncf %91 : vector<8x32xf32> to vector<8x32xbf16>
    %c0_33 = arith.constant 0 : index
    %c0_34 = arith.constant 0 : index
    %93 = vector.load %arg9[%c0_33, %c0_34] : memref<32x128xbf16, #tpu.memory_space<vmem>>, vector<32x128xbf16>
    %cst_35 = arith.constant dense<0.000000e+00> : vector<8x128xf32>
    %94 = tpu.matmul %92, %93, %cst_35 {dimension_numbers = #tpu.dot_dimension_numbers<[1], [0], [0], [1], [0, 0, 1, 1], [], []>} : vector<8x32xbf16>, vector<32x128xbf16>, vector<8x128xf32> -> vector<8x128xf32>
    %c0_36 = arith.constant 0 : index
    %c0_37 = arith.constant 0 : index
    %95 = vector.load %arg10[%c0_36, %c0_37] : memref<1x128xf32, #tpu.memory_space<vmem>>, vector<1x128xf32>
    %96 = vector.shape_cast %95 : vector<1x128xf32> to vector<128xf32>
    %97 = vector.shape_cast %96 : vector<128xf32> to vector<1x128xf32>
    %98 = vector.broadcast %97 : vector<1x128xf32> to vector<8x128xf32>
    %99 = arith.addf %94, %98 : vector<8x128xf32>
    %cst_38 = arith.constant 5.000000e-01 : f32
    %100 = vector.broadcast %cst_38 : f32 to vector<8x128xf32>
    %101 = arith.mulf %100, %99 : vector<8x128xf32>
    %cst_39 = arith.constant 0.707106769 : f32
    %102 = vector.broadcast %cst_39 : f32 to vector<8x128xf32>
    %103 = arith.mulf %99, %102 : vector<8x128xf32>
    %104 = math.erf %103 : vector<8x128xf32>
    %cst_40 = arith.constant 1.000000e+00 : f32
    %105 = vector.broadcast %cst_40 : f32 to vector<8x128xf32>
    %106 = arith.addf %105, %104 : vector<8x128xf32>
    %107 = arith.mulf %101, %106 : vector<8x128xf32>
    %108 = arith.truncf %107 : vector<8x128xf32> to vector<8x128xbf16>
    %c0_41 = arith.constant 0 : index
    %c0_42 = arith.constant 0 : index
    %109 = vector.load %arg11[%c0_41, %c0_42] : memref<128x32xbf16, #tpu.memory_space<vmem>>, vector<128x32xbf16>
    %cst_43 = arith.constant dense<0.000000e+00> : vector<8x32xf32>
    %110 = tpu.matmul %108, %109, %cst_43 {dimension_numbers = #tpu.dot_dimension_numbers<[1], [0], [0], [1], [0, 0, 1, 1], [], []>} : vector<8x128xbf16>, vector<128x32xbf16>, vector<8x32xf32> -> vector<8x32xf32>
    %c0_44 = arith.constant 0 : index
    %c0_45 = arith.constant 0 : index
    %111 = vector.load %arg12[%c0_44, %c0_45] : memref<1x32xf32, #tpu.memory_space<vmem>>, vector<1x32xf32>
    %112 = vector.shape_cast %111 : vector<1x32xf32> to vector<32xf32>
    %113 = vector.shape_cast %112 : vector<32xf32> to vector<1x32xf32>
    %114 = vector.broadcast %113 : vector<1x32xf32> to vector<8x32xf32>
    %115 = arith.addf %110, %114 : vector<8x32xf32>
    %116 = arith.addf %63, %115 : vector<8x32xf32>
    %c0_46 = arith.constant 0 : index
    %c0_47 = arith.constant 0 : index
    %c0_48 = arith.constant 0 : index
    %117 = vector.load %arg13[%c0_46, %c0_47, %c0_48] : memref<1x8x32xf32, #tpu.memory_space<vmem>>, vector<1x8x32xf32>
    %118 = vector.shape_cast %117 : vector<1x8x32xf32> to vector<8x32xf32>
    %119 = vector.shape_cast %116 : vector<8x32xf32> to vector<1x8x32xf32>
    tpu.vector_store %arg13[%c0_46, %c0_47, %c0_48], %119 {strides = array<i32>} : memref<1x8x32xf32, #tpu.memory_space<vmem>>, vector<1x8x32xf32>,
    return
  }
  func.func @transform_0(%arg0: i32) -> (i32, i32, i32) {
    %c0_i32 = arith.constant 0 : i32
    %c0_i32_0 = arith.constant 0 : i32
    %c0_i32_1 = arith.constant 0 : i32
    return %arg0, %c0_i32, %c0_i32_0 : i32, i32, i32
  }
  func.func @transform_1(%arg0: i32) -> (i32, i32) {
    %c0_i32 = arith.constant 0 : i32
    %c0_i32_0 = arith.constant 0 : i32
    %c0_i32_1 = arith.constant 0 : i32
    return %c0_i32, %c0_i32_0 : i32, i32
  }
  func.func @transform_2(%arg0: i32) -> (i32, i32) {
    %c0_i32 = arith.constant 0 : i32
    %c0_i32_0 = arith.constant 0 : i32
    %c0_i32_1 = arith.constant 0 : i32
    return %c0_i32, %c0_i32_0 : i32, i32
  }
  func.func @transform_3(%arg0: i32) -> (i32, i32) {
    %c0_i32 = arith.constant 0 : i32
    %c0_i32_0 = arith.constant 0 : i32
    %c0_i32_1 = arith.constant 0 : i32
    return %c0_i32, %c0_i32_0 : i32, i32
  }
  func.func @transform_4(%arg0: i32) -> (i32, i32, i32) {
    %c0_i32 = arith.constant 0 : i32
    %c0_i32_0 = arith.constant 0 : i32
    %c0_i32_1 = arith.constant 0 : i32
    %c0_i32_2 = arith.constant 0 : i32
    return %c0_i32, %c0_i32_0, %c0_i32_1 : i32, i32, i32
  }
  func.func @transform_5(%arg0: i32) -> (i32, i32) {
    %c0_i32 = arith.constant 0 : i32
    %c0_i32_0 = arith.constant 0 : i32
    %c0_i32_1 = arith.constant 0 : i32
    return %c0_i32, %c0_i32_0 : i32, i32
  }
  func.func @transform_6(%arg0: i32) -> (i32, i32) {
    %c0_i32 = arith.constant 0 : i32
    %c0_i32_0 = arith.constant 0 : i32
    %c0_i32_1 = arith.constant 0 : i32
    return %c0_i32, %c0_i32_0 : i32, i32
  }
  func.func @transform_7(%arg0: i32) -> (i32, i32) {
    %c0_i32 = arith.constant 0 : i32
    %c0_i32_0 = arith.constant 0 : i32
    %c0_i32_1 = arith.constant 0 : i32
    return %c0_i32, %c0_i32_0 : i32, i32
  }
  func.func @transform_8(%arg0: i32) -> (i32, i32) {
    %c0_i32 = arith.constant 0 : i32
    %c0_i32_0 = arith.constant 0 : i32
    %c0_i32_1 = arith.constant 0 : i32
    return %c0_i32, %c0_i32_0 : i32, i32
  }
  func.func @transform_9(%arg0: i32) -> (i32, i32) {
    %c0_i32 = arith.constant 0 : i32
    %c0_i32_0 = arith.constant 0 : i32
    %c0_i32_1 = arith.constant 0 : i32
    return %c0_i32, %c0_i32_0 : i32, i32
  }
  func.func @transform_10(%arg0: i32) -> (i32, i32) {
    %c0_i32 = arith.constant 0 : i32
    %c0_i32_0 = arith.constant 0 : i32
    %c0_i32_1 = arith.constant 0 : i32
    return %c0_i32, %c0_i32_0 : i32, i32
  }
  func.func @transform_11(%arg0: i32) -> (i32, i32) {
    %c0_i32 = arith.constant 0 : i32
    %c0_i32_0 = arith.constant 0 : i32
    %c0_i32_1 = arith.constant 0 : i32
    return %c0_i32, %c0_i32_0 : i32, i32
  }
  func.func @transform_12(%arg0: i32) -> (i32, i32, i32) {
    %c0_i32 = arith.constant 0 : i32
    %c0_i32_0 = arith.constant 0 : i32
    %c0_i32_1 = arith.constant 0 : i32
    return %arg0, %c0_i32, %c0_i32_0 : i32, i32, i32
  }
}

module attributes {stable_mosaic.version = 11 : i64} {
  func.func @kernel(%arg0: i32, %arg1: memref<1x8x32xf32, #tpu.memory_space<vmem>>, %arg2: memref<1x32xf32, #tpu.memory_space<vmem>>, %arg3: memref<1x32xf32, #tpu.memory_space<vmem>>, %arg4: memref<32x96xbf16, #tpu.memory_space<vmem>>, %arg5: memref<4x8x32xbf16, #tpu.memory_space<vmem>>, %arg6: memref<1x32xf32, #tpu.memory_space<vmem>>, %arg7: memref<1x32xf32, #tpu.memory_space<vmem>>, %arg8: memref<1x32xf32, #tpu.memory_space<vmem>>, %arg9: memref<32x128xbf16, #tpu.memory_space<vmem>>, %arg10: memref<1x128xf32, #tpu.memory_space<vmem>>, %arg11: memref<128x32xbf16, #tpu.memory_space<vmem>>, %arg12: memref<1x32xf32, #tpu.memory_space<vmem>>, %arg13: memref<1x8x32xf32, #tpu.memory_space<vmem>>) attributes {dimension_semantics = [#tpu.dimension_semantics<parallel>], iteration_bounds = array<i64: 2>, scalar_prefetch = 0 : i64, scratch_operands = 0 : i64, tpu.core_type = #tpu.core_type<tc>, window_params = [{transform_indices = @transform_0, window_bounds = array<i64: 1, 8, 32>}, {pipeline_mode = #tpu.pipeline_mode<synchronous>, transform_indices = @transform_1, window_bounds = array<i64: 1, 32>}, {pipeline_mode = #tpu.pipeline_mode<synchronous>, transform_indices = @transform_2, window_bounds = array<i64: 1, 32>}, {pipeline_mode = #tpu.pipeline_mode<synchronous>, transform_indices = @transform_3, window_bounds = array<i64: 32, 96>}, {pipeline_mode = #tpu.pipeline_mode<synchronous>, transform_indices = @transform_4, window_bounds = array<i64: 4, 8, 32>}, {pipeline_mode = #tpu.pipeline_mode<synchronous>, transform_indices = @transform_5, window_bounds = array<i64: 1, 32>}, {pipeline_mode = #tpu.pipeline_mode<synchronous>, transform_indices = @transform_6, window_bounds = array<i64: 1, 32>}, {pipeline_mode = #tpu.pipeline_mode<synchronous>, transform_indices = @transform_7, window_bounds = array<i64: 1, 32>}, {pipeline_mode = #tpu.pipeline_mode<synchronous>, transform_indices = @transform_8, window_bounds = array<i64: 32, 128>}, {pipeline_mode = #tpu.pipeline_mode<synchronous>, transform_indices = @transform_9, window_bounds = array<i64: 1, 128>}, {pipeline_mode = #tpu.pipeline_mode<synchronous>, transform_indices = @transform_10, window_bounds = array<i64: 128, 32>}, {pipeline_mode = #tpu.pipeline_mode<synchronous>, transform_indices = @transform_11, window_bounds = array<i64: 1, 32>}, {transform_indices = @transform_12, window_bounds = array<i64: 1, 8, 32>}]} {
    %c0 = arith.constant 0 : index
    %c0_0 = arith.constant 0 : index
    %c0_1 = arith.constant 0 : index
    %0 = vector.load %arg1[%c0, %c0_0, %c0_1] : memref<1x8x32xf32, #tpu.memory_space<vmem>>, vector<1x8x32xf32>
    %1 = vector.shape_cast %0 : vector<1x8x32xf32> to vector<8x32xf32>
    %cst = arith.constant dense<0.000000e+00> : vector<8xf32>
    %2 = vector.multi_reduction <add>, %1, %cst [1] : vector<8x32xf32> to vector<8xf32>
    %3 = vector.shape_cast %2 : vector<8xf32> to vector<8x1xf32>
    %cst_2 = arith.constant 3.200000e+01 : f32
    %4 = vector.broadcast %cst_2 : f32 to vector<8x1xf32>
    %5 = arith.divf %3, %4 : vector<8x1xf32>
    %6 = vector.broadcast %5 : vector<8x1xf32> to vector<8x32xf32>
    %7 = arith.subf %1, %6 : vector<8x32xf32>
    %8 = arith.mulf %7, %7 : vector<8x32xf32>
    %cst_3 = arith.constant dense<0.000000e+00> : vector<8xf32>
    %9 = vector.multi_reduction <add>, %8, %cst_3 [1] : vector<8x32xf32> to vector<8xf32>
    %10 = vector.shape_cast %9 : vector<8xf32> to vector<8x1xf32>
    %cst_4 = arith.constant 3.200000e+01 : f32
    %11 = vector.broadcast %cst_4 : f32 to vector<8x1xf32>
    %12 = arith.divf %10, %11 : vector<8x1xf32>
    %13 = vector.broadcast %5 : vector<8x1xf32> to vector<8x32xf32>
    %14 = arith.subf %1, %13 : vector<8x32xf32>
    %cst_5 = arith.constant 9.99999974E-6 : f32
    %15 = vector.broadcast %cst_5 : f32 to vector<8x1xf32>
    %16 = arith.addf %12, %15 : vector<8x1xf32>
    %17 = math.rsqrt %16 : vector<8x1xf32>
    %18 = vector.broadcast %17 : vector<8x1xf32> to vector<8x32xf32>
    %19 = arith.mulf %14, %18 : vector<8x32xf32>
    %c0_6 = arith.constant 0 : index
    %c0_7 = arith.constant 0 : index
    %20 = vector.load %arg2[%c0_6, %c0_7] : memref<1x32xf32, #tpu.memory_space<vmem>>, vector<1x32xf32>
    %21 = vector.shape_cast %20 : vector<1x32xf32> to vector<32xf32>
    %22 = vector.shape_cast %21 : vector<32xf32> to vector<1x32xf32>
    %23 = vector.broadcast %22 : vector<1x32xf32> to vector<8x32xf32>
    %24 = arith.mulf %19, %23 : vector<8x32xf32>
    %c0_8 = arith.constant 0 : index
    %c0_9 = arith.constant 0 : index
    %25 = vector.load %arg3[%c0_8, %c0_9] : memref<1x32xf32, #tpu.memory_space<vmem>>, vector<1x32xf32>
    %26 = vector.shape_cast %25 : vector<1x32xf32> to vector<32xf32>
    %27 = vector.shape_cast %26 : vector<32xf32> to vector<1x32xf32>
    %28 = vector.broadcast %27 : vector<1x32xf32> to vector<8x32xf32>
    %29 = arith.addf %24, %28 : vector<8x32xf32>
    %30 = arith.truncf %29 : vector<8x32xf32> to vector<8x32xbf16>
    %c0_10 = arith.constant 0 : index
    %c0_11 = arith.constant 0 : index
    %31 = vector.load %arg4[%c0_10, %c0_11] : memref<32x96xbf16, #tpu.memory_space<vmem>>, vector<32x96xbf16>
    %cst_12 = arith.constant dense<0.000000e+00> : vector<8x96xf32>
    %32 = tpu.matmul %30, %31, %cst_12 {dimension_numbers = #tpu.dot_dimension_numbers<[1], [0], [0], [1], [0, 0, 1, 1], [], []>} : vector<8x32xbf16>, vector<32x96xbf16>, vector<8x96xf32> -> vector<8x96xf32>
    %33 = vector.shape_cast %32 : vector<8x96xf32> to vector<8x12x8xf32>
    %34 = tpu.transpose %33, [1, 0, 2] : vector<8x12x8xf32> -> vector<12x8x8xf32>
    %35 = vector.extract_strided_slice %34 {offsets = [0, 0, 0], sizes = [4, 8, 8], strides = [1, 1, 1]} : vector<12x8x8xf32> to vector<4x8x8xf32>
    %36 = arith.truncf %35 : vector<4x8x8xf32> to vector<4x8x8xbf16>
    %37 = vector.extract_strided_slice %34 {offsets = [4, 0, 0], sizes = [4, 8, 8], strides = [1, 1, 1]} : vector<12x8x8xf32> to vector<4x8x8xf32>
    %38 = arith.truncf %37 : vector<4x8x8xf32> to vector<4x8x8xbf16>
    %39 = vector.extract_strided_slice %34 {offsets = [8, 0, 0], sizes = [4, 8, 8], strides = [1, 1, 1]} : vector<12x8x8xf32> to vector<4x8x8xf32>
    %40 = arith.truncf %39 : vector<4x8x8xf32> to vector<4x8x8xbf16>
    "tpu.trace_start"() <{level = 10 : i32, message = "hqd,hkd->hqk"}> : () -> ()
    %cst_13 = arith.constant dense<0.000000e+00> : vector<4x8x8xf32>
    %41 = tpu.matmul %36, %38, %cst_13 {dimension_numbers = #tpu.dot_dimension_numbers<[2], [2], [1], [1], [0, 0, 0, 1, 1, 1], [0], [0]>} : vector<4x8x8xbf16>, vector<4x8x8xbf16>, vector<4x8x8xf32> -> vector<4x8x8xf32>
    "tpu.trace_stop"() : () -> ()
    %cst_14 = arith.constant dense<0xFF800000> : vector<4x8xf32>
    %42 = vector.multi_reduction <maximumf>, %41, %cst_14 [2] : vector<4x8x8xf32> to vector<4x8xf32>
    %43 = vector.shape_cast %42 : vector<4x8xf32> to vector<4x8x1xf32>
    %44 = vector.broadcast %43 : vector<4x8x1xf32> to vector<4x8x8xf32>
    %45 = arith.subf %41, %44 : vector<4x8x8xf32>
    %46 = math.exp %45 : vector<4x8x8xf32>
    %cst_15 = arith.constant dense<0.000000e+00> : vector<4x8xf32>
    %47 = vector.multi_reduction <add>, %46, %cst_15 [2] : vector<4x8x8xf32> to vector<4x8xf32>
    %48 = vector.shape_cast %47 : vector<4x8xf32> to vector<4x8x1xf32>
    %49 = tpu.reciprocal %48 {approx = true} : vector<4x8x1xf32> -> vector<4x8x1xf32>
    %50 = vector.broadcast %49 : vector<4x8x1xf32> to vector<4x8x8xf32>
    %51 = arith.mulf %46, %50 : vector<4x8x8xf32>
    %52 = arith.truncf %51 : vector<4x8x8xf32> to vector<4x8x8xbf16>
    "tpu.trace_start"() <{level = 10 : i32, message = "hqk,hkd->hqd"}> : () -> ()
    %cst_16 = arith.constant dense<0.000000e+00> : vector<4x8x8xf32>
    %53 = tpu.matmul %52, %40, %cst_16 {dimension_numbers = #tpu.dot_dimension_numbers<[2], [1], [1], [2], [0, 0, 0, 1, 1, 2], [0], [0]>} : vector<4x8x8xbf16>, vector<4x8x8xbf16>, vector<4x8x8xf32> -> vector<4x8x8xf32>
    "tpu.trace_stop"() : () -> ()
    %54 = arith.truncf %53 : vector<4x8x8xf32> to vector<4x8x8xbf16>
    %c0_17 = arith.constant 0 : index
    %c0_18 = arith.constant 0 : index
    %c0_19 = arith.constant 0 : index
    %55 = vector.load %arg5[%c0_17, %c0_18, %c0_19] : memref<4x8x32xbf16, #tpu.memory_space<vmem>>, vector<4x8x32xbf16>
    "tpu.trace_start"() <{level = 10 : i32, message = "hnd,hdc->hnc"}> : () -> ()
    %cst_20 = arith.constant dense<0.000000e+00> : vector<4x8x32xf32>
    %56 = tpu.matmul %54, %55, %cst_20 {dimension_numbers = #tpu.dot_dimension_numbers<[2], [1], [1], [2], [0, 0, 0, 1, 1, 2], [0], [0]>} : vector<4x8x8xbf16>, vector<4x8x32xbf16>, vector<4x8x32xf32> -> vector<4x8x32xf32>
    "tpu.trace_stop"() : () -> ()
    %cst_21 = arith.constant dense<0.000000e+00> : vector<8x32xf32>
    %57 = vector.multi_reduction <add>, %56, %cst_21 [0] : vector<4x8x32xf32> to vector<8x32xf32>
    %c0_22 = arith.constant 0 : index
    %c0_23 = arith.constant 0 : index
    %58 = vector.load %arg6[%c0_22, %c0_23] : memref<1x32xf32, #tpu.memory_space<vmem>>, vector<1x32xf32>
    %59 = vector.shape_cast %58 : vector<1x32xf32> to vector<32xf32>
    %60 = vector.shape_cast %59 : vector<32xf32> to vector<1x32xf32>
    %61 = vector.broadcast %60 : vector<1x32xf32> to vector<8x32xf32>
    %62 = arith.addf %57, %61 : vector<8x32xf32>
    %63 = arith.addf %1, %62 : vector<8x32xf32>
    %cst_24 = arith.constant dense<0.000000e+00> : vector<8xf32>
    %64 = vector.multi_reduction <add>, %63, %cst_24 [1] : vector<8x32xf32> to vector<8xf32>
    %65 = vector.shape_cast %64 : vector<8xf32> to vector<8x1xf32>
    %cst_25 = arith.constant 3.200000e+01 : f32
    %66 = vector.broadcast %cst_25 : f32 to vector<8x1xf32>
    %67 = arith.divf %65, %66 : vector<8x1xf32>
    %68 = vector.broadcast %67 : vector<8x1xf32> to vector<8x32xf32>
    %69 = arith.subf %63, %68 : vector<8x32xf32>
    %70 = arith.mulf %69, %69 : vector<8x32xf32>
    %cst_26 = arith.constant dense<0.000000e+00> : vector<8xf32>
    %71 = vector.multi_reduction <add>, %70, %cst_26 [1] : vector<8x32xf32> to vector<8xf32>
    %72 = vector.shape_cast %71 : vector<8xf32> to vector<8x1xf32>
    %cst_27 = arith.constant 3.200000e+01 : f32
    %73 = vector.broadcast %cst_27 : f32 to vector<8x1xf32>
    %74 = arith.divf %72, %73 : vector<8x1xf32>
    %75 = vector.broadcast %67 : vector<8x1xf32> to vector<8x32xf32>
    %76 = arith.subf %63, %75 : vector<8x32xf32>
    %cst_28 = arith.constant 9.99999974E-6 : f32
    %77 = vector.broadcast %cst_28 : f32 to vector<8x1xf32>
    %78 = arith.addf %74, %77 : vector<8x1xf32>
    %79 = math.rsqrt %78 : vector<8x1xf32>
    %80 = vector.broadcast %79 : vector<8x1xf32> to vector<8x32xf32>
    %81 = arith.mulf %76, %80 : vector<8x32xf32>
    %c0_29 = arith.constant 0 : index
    %c0_30 = arith.constant 0 : index
    %82 = vector.load %arg7[%c0_29, %c0_30] : memref<1x32xf32, #tpu.memory_space<vmem>>, vector<1x32xf32>
    %83 = vector.shape_cast %82 : vector<1x32xf32> to vector<32xf32>
    %84 = vector.shape_cast %83 : vector<32xf32> to vector<1x32xf32>
    %85 = vector.broadcast %84 : vector<1x32xf32> to vector<8x32xf32>
    %86 = arith.mulf %81, %85 : vector<8x32xf32>
    %c0_31 = arith.constant 0 : index
    %c0_32 = arith.constant 0 : index
    %87 = vector.load %arg8[%c0_31, %c0_32] : memref<1x32xf32, #tpu.memory_space<vmem>>, vector<1x32xf32>
    %88 = vector.shape_cast %87 : vector<1x32xf32> to vector<32xf32>
    %89 = vector.shape_cast %88 : vector<32xf32> to vector<1x32xf32>
    %90 = vector.broadcast %89 : vector<1x32xf32> to vector<8x32xf32>
    %91 = arith.addf %86, %90 : vector<8x32xf32>
    %92 = arith.truncf %91 : vector<8x32xf32> to vector<8x32xbf16>
    %c0_33 = arith.constant 0 : index
    %c0_34 = arith.constant 0 : index
    %93 = vector.load %arg9[%c0_33, %c0_34] : memref<32x128xbf16, #tpu.memory_space<vmem>>, vector<32x128xbf16>
    %cst_35 = arith.constant dense<0.000000e+00> : vector<8x128xf32>
    %94 = tpu.matmul %92, %93, %cst_35 {dimension_numbers = #tpu.dot_dimension_numbers<[1], [0], [0], [1], [0, 0, 1, 1], [], []>} : vector<8x32xbf16>, vector<32x128xbf16>, vector<8x128xf32> -> vector<8x128xf32>
    %c0_36 = arith.constant 0 : index
    %c0_37 = arith.constant 0 : index
    %95 = vector.load %arg10[%c0_36, %c0_37] : memref<1x128xf32, #tpu.memory_space<vmem>>, vector<1x128xf32>
    %96 = vector.shape_cast %95 : vector<1x128xf32> to vector<128xf32>
    %97 = vector.shape_cast %96 : vector<128xf32> to vector<1x128xf32>
    %98 = vector.broadcast %97 : vector<1x128xf32> to vector<8x128xf32>
    %99 = arith.addf %94, %98 : vector<8x128xf32>
    %cst_38 = arith.constant 5.000000e-01 : f32
    %100 = vector.broadcast %cst_38 : f32 to vector<8x128xf32>
    %101 = arith.mulf %100, %99 : vector<8x128xf32>
    %cst_39 = arith.constant 0.707106769 : f32
    %102 = vector.broadcast %cst_39 : f32 to vector<8x128xf32>
    %103 = arith.mulf %99, %102 : vector<8x128xf32>
    %104 = math.erf %103 : vector<8x128xf32>
    %cst_40 = arith.constant 1.000000e+00 : f32
    %105 = vector.broadcast %cst_40 : f32 to vector<8x128xf32>
    %106 = arith.addf %105, %104 : vector<8x128xf32>
    %107 = arith.mulf %101, %106 : vector<8x128xf32>
    %108 = arith.truncf %107 : vector<8x128xf32> to vector<8x128xbf16>
    %c0_41 = arith.constant 0 : index
    %c0_42 = arith.constant 0 : index
    %109 = vector.load %arg11[%c0_41, %c0_42] : memref<128x32xbf16, #tpu.memory_space<vmem>>, vector<128x32xbf16>
    %cst_43 = arith.constant dense<0.000000e+00> : vector<8x32xf32>
    %110 = tpu.matmul %108, %109, %cst_43 {dimension_numbers = #tpu.dot_dimension_numbers<[1], [0], [0], [1], [0, 0, 1, 1], [], []>} : vector<8x128xbf16>, vector<128x32xbf16>, vector<8x32xf32> -> vector<8x32xf32>
    %c0_44 = arith.constant 0 : index
    %c0_45 = arith.constant 0 : index
    %111 = vector.load %arg12[%c0_44, %c0_45] : memref<1x32xf32, #tpu.memory_space<vmem>>, vector<1x32xf32>
    %112 = vector.shape_cast %111 : vector<1x32xf32> to vector<32xf32>
    %113 = vector.shape_cast %112 : vector<32xf32> to vector<1x32xf32>
    %114 = vector.broadcast %113 : vector<1x32xf32> to vector<8x32xf32>
    %115 = arith.addf %110, %114 : vector<8x32xf32>
    %116 = arith.addf %63, %115 : vector<8x32xf32>
    %c0_46 = arith.constant 0 : index
    %c0_47 = arith.constant 0 : index
    %c0_48 = arith.constant 0 : index
    %117 = vector.load %arg13[%c0_46, %c0_47, %c0_48] : memref<1x8x32xf32, #tpu.memory_space<vmem>>, vector<1x8x32xf32>
    %118 = vector.shape_cast %117 : vector<1x8x32xf32> to vector<8x32xf32>
    %119 = vector.shape_cast %116 : vector<8x32xf32> to vector<1x8x32xf32>
    tpu.vector_store %arg13[%c0_46, %c0_47, %c0_48], %119 {strides = array<i32>} : memref<1x8x32xf32, #tpu.memory_space<vmem>>, vector<1x8x32xf32>,
    return
  }
  func.func @transform_0(%arg0: i32) -> (i32, i32, i32) {
    %c0_i32 = arith.constant 0 : i32
    %c0_i32_0 = arith.constant 0 : i32
    %c0_i32_1 = arith.constant 0 : i32
    return %arg0, %c0_i32, %c0_i32_0 : i32, i32, i32
  }
  func.func @transform_1(%arg0: i32) -> (i32, i32) {
    %c0_i32 = arith.constant 0 : i32
    %c0_i32_0 = arith.constant 0 : i32
    %c0_i32_1 = arith.constant 0 : i32
    return %c0_i32, %c0_i32_0 : i32, i32
  }
  func.func @transform_2(%arg0: i32) -> (i32, i32) {
    %c0_i32 = arith.constant 0 : i32
    %c0_i32_0 = arith.constant 0 : i32
    %c0_i32_1 = arith.constant 0 : i32
    return %c0_i32, %c0_i32_0 : i32, i32
  }
  func.func @transform_3(%arg0: i32) -> (i32, i32) {
    %c0_i32 = arith.constant 0 : i32
    %c0_i32_0 = arith.constant 0 : i32
    %c0_i32_1 = arith.constant 0 : i32
    return %c0_i32, %c0_i32_0 : i32, i32
  }
  func.func @transform_4(%arg0: i32) -> (i32, i32, i32) {
    %c0_i32 = arith.constant 0 : i32
    %c0_i32_0 = arith.constant 0 : i32
    %c0_i32_1 = arith.constant 0 : i32
    %c0_i32_2 = arith.constant 0 : i32
    return %c0_i32, %c0_i32_0, %c0_i32_1 : i32, i32, i32
  }
  func.func @transform_5(%arg0: i32) -> (i32, i32) {
    %c0_i32 = arith.constant 0 : i32
    %c0_i32_0 = arith.constant 0 : i32
    %c0_i32_1 = arith.constant 0 : i32
    return %c0_i32, %c0_i32_0 : i32, i32
  }
  func.func @transform_6(%arg0: i32) -> (i32, i32) {
    %c0_i32 = arith.constant 0 : i32
    %c0_i32_0 = arith.constant 0 : i32
    %c0_i32_1 = arith.constant 0 : i32
    return %c0_i32, %c0_i32_0 : i32, i32
  }
  func.func @transform_7(%arg0: i32) -> (i32, i32) {
    %c0_i32 = arith.constant 0 : i32
    %c0_i32_0 = arith.constant 0 : i32
    %c0_i32_1 = arith.constant 0 : i32
    return %c0_i32, %c0_i32_0 : i32, i32
  }
  func.func @transform_8(%arg0: i32) -> (i32, i32) {
    %c0_i32 = arith.constant 0 : i32
    %c0_i32_0 = arith.constant 0 : i32
    %c0_i32_1 = arith.constant 0 : i32
    return %c0_i32, %c0_i32_0 : i32, i32
  }
  func.func @transform_9(%arg0: i32) -> (i32, i32) {
    %c0_i32 = arith.constant 0 : i32
    %c0_i32_0 = arith.constant 0 : i32
    %c0_i32_1 = arith.constant 0 : i32
    return %c0_i32, %c0_i32_0 : i32, i32
  }
  func.func @transform_10(%arg0: i32) -> (i32, i32) {
    %c0_i32 = arith.constant 0 : i32
    %c0_i32_0 = arith.constant 0 : i32
    %c0_i32_1 = arith.constant 0 : i32
    return %c0_i32, %c0_i32_0 : i32, i32
  }
  func.func @transform_11(%arg0: i32) -> (i32, i32) {
    %c0_i32 = arith.constant 0 : i32
    %c0_i32_0 = arith.constant 0 : i32
    %c0_i32_1 = arith.constant 0 : i32
    return %c0_i32, %c0_i32_0 : i32, i32
  }
  func.func @transform_12(%arg0: i32) -> (i32, i32, i32) {
    %c0_i32 = arith.constant 0 : i32
    %c0_i32_0 = arith.constant 0 : i32
    %c0_i32_1 = arith.constant 0 : i32
    return %arg0, %c0_i32, %c0_i32_0 : i32, i32, i32
  }
}

</mosaic_0001>

<bundles_post_ra>
// kernel: tpu_custom_call.1
= control target key start
LH: loop header
LB: loop body
LE: loop exit
PB: predicated region body
PF: predicated region fallthrough
CT: control target
= control target key end

     0   :  { %17 = vsyncpa [#allocation3], 0  ;;  %s2802_s0 = inlined_call_operand.hbm [shape: f32[2,8,32], index: 0, kind: input, shape index: {}, may-alias: {0,12}]   ;;  %s2803_s1 = inlined_call_operand.vmem [shape: f32[1,32], index: 1, kind: input, shape index: {}]   ;;  %s2804_s2 = inlined_call_operand.vmem [shape: f32[1,32], index: 2, kind: input, shape index: {}]   ;;  %s2805_s3 = inlined_call_operand.vmem [shape: bf16[32,96], index: 3, kind: input, shape index: {}]   ;;  %s2806_s4 = inlined_call_operand.vmem [shape: bf16[4,8,32], index: 4, kind: input, shape index: {}]   ;;  %s2807_s5 = inlined_call_operand.vmem [shape: f32[1,32], index: 5, kind: input, shape index: {}]   ;;  %s2808_s6 = inlined_call_operand.vmem [shape: f32[1,32], index: 6, kind: input, shape index: {}]   ;;  %s2809_s7 = inlined_call_operand.vmem [shape: f32[1,32], index: 7, kind: input, shape index: {}]   ;;  %s2810_s8 = inlined_call_operand.vmem [shape: bf16[32,128], index: 8, kind: input, shape index: {}]   ;;  %s2811_s9 = inlined_call_operand.vmem [shape: f32[1,128], index: 9, kind: input, shape index: {}]   ;;  %s2812_s10 = inlined_call_operand.vmem [shape: bf16[128,32], index: 10, kind: input, shape index: {}]   ;;  %s2813_s11 = inlined_call_operand.vmem [shape: f32[1,32], index: 11, kind: input, shape index: {}]   ;;  %s2814_s12 = inlined_call_operand.hbm [shape: f32[2,8,32], index: 12, kind: output, shape index: {}, may-alias: {0,12}]  }
   0x1   :  { %19 = vsyncpa [#allocation3 + $0x1], 0 }
   0x2   :  { %20 = vsyncpa [#allocation4], 0 }
   0x3   :  { %22 = vsyncpa [#allocation4 + $0x1], 0  ;;  %s2378_s21 = smov 0   ;;  %s2380_s22 = smov 0  }
   0x4   :  { %s2382_s23 = smov 0   ;;  %s2384_s24 = smov 0  }
   0x5 LB: > { %2819 = sst [smem:[#allocation8_spill]] %s2290_s23  ;;  %s2399_s25 = sadd.s32 4294967295, %s2294_s24   ;;  %s2294_s24 = sphi %s2384_s24, %s2832_s24   ;;  %s2290_s23 = sphi %s2382_s23, %s2834_s23   ;;  %s2286_s22 = sphi %s2380_s22, %s2836_s22   ;;  %s2282_s21 = sphi %s2378_s21, %s2835_s21  }
   0x6   : > { %s1901_s26 = sadd.s32 4294967294, %s2294_s24   ;;  %s2403_s27 = sadd.s32 1, %s2294_s24  }
   0x7   : > { %2820 = sst [smem:[#allocation9_spill]] %s2403_s27  ;;  %s35_s28 = sadd.s32 1, %s2290_s23 }
   0x8   : > { %s32_s29 = ssub.s32 %s2294_s24, %s2403_s27  ;;  %p42_p0 = scmp.ne.s32.totalorder %s2290_s23, %s2286_s22 }
   0x9   : > { %p33_p1 = scmp.eq.s32.totalorder %s32_s29, 0  ;;  %p43_p2 = scmp.eq.s32.totalorder %s2294_s24, 0 }
   0xa   : > { %p48_p3 = scmp.ne.s32.totalorder %s2286_s22, %s2282_s21  ;;  %p49_p4 = scmp.eq.s32.totalorder %s2399_s25, 0 }
   0xb   : > { %s2415_s30 = scalar_select %p33_p1, %s2290_s23, %s35_s28  }
   0xc   : > { %p2417_p5 = por %p43_p2, %p42_p0  ;;  %p2421_p6 = por %p49_p4, %p48_p3 }
   0xd   : > { %2821 = sst [smem:[#allocation10_spill]] %s2415_s30  ;;  %p303_p7 = scmp.eq.s32.totalorder %s2399_s25, 1 }
   0xe   : > { %p309_p8 = scmp.eq.s32.totalorder %s1901_s26, 1  ;;  %p2115_p10 = scmp.lt.s32.totalorder %s2294_s24, 2 }
   0xf   : > { %p2428_p11 = por %p303_p7, %p42_p0  ;;  %s362_s17 = sand.u32 1, %s2290_s23  }
  0x10   : > { %p2432_p12 = por %p309_p8, %p48_p3  ;;  %s1905_s18 = sshll.u32 %s2294_s24, 7 }
  0x11   : > { %s2824_s15 = scalar_select %p2428_p11, 1, 0 }
  0x12   : > { %s2825_s16 = scalar_select %p2432_p12, 1, 0 }
  0x13   : > { %s1904_s19 = sshll.u32 %s362_s17, 3  ;;  %s2441_s29 = scalar_lea.hbm %s2802_s0, %s1905_s18 }
  0x14   : > { %s366_s26 = scalar_lea.vmem [#allocation2], %s1904_s19  ;;  %p2445_p13 = pnand %p2115_p10, %p2417_p5 }
  0x15   : > { %s373_s30 = sshll.u32 %s366_s26, 4  ;;  %s363_s20 = scalar_lea.sflag [#allocation3], %s362_s17  ;;  %s2449_s30 = int_to_ptr.vmem [resolvable:$true] %s373_s30 }
  0x16   : > { %s2198_s18 = scalar_lea.hbm %s2441_s29, 128  ;;  %p2200_p3 = pneg %p2445_p13 }
  0x17   : > { %p2199_p2 = scmp.ne.s32.totalorder %s2441_s29, %s2198_s18  ;;  %s2203_s28 = scalar_lea.hbm %s2802_s0, 256 }
  0x18   : > { %p2204_p5 = scmp.lt.u32.totalorder %s2441_s29, %s2802_s0  ;;  %p2205_p8 = scmp.lt.u32.totalorder %s2203_s28, %s2198_s18 }
  0x19   : > { %p2201_p4 = pnand %p2200_p3, %p2199_p2  ;;  %p2207_p9 = scmp.lt.u32.totalorder %s2198_s18, %s2441_s29 }
  0x1a   : > { %p2206_p10 = por %p2205_p8, %p2204_p5 }
  0x1b   : > { %p2202_p7 = pneg %p2201_p4 }
  0x1c   : > { %p2208_p0 = por %p2207_p9, %p2206_p10 }
  0x1e   : > { %p2209_p1 = pnand %p2208_p0, %p2202_p7 }
  0x20   : > { %2212 = shalt.err (!%p2209_p1)
}
  0x21   : > { %s2213_s17 = scalar_lea.vmem %s2449_s30, 128  ;;  %s2296_s13 = smov [#allocation2]  }
  0x22   : > { %p2214_p2 = scmp.ne.s32.totalorder %s2449_s30, %s2213_s17  ;;  %s2218_s19 = sshll.u32 %s2296_s13, 4  ;;  %s2219_s19 = int_to_ptr.vmem [resolvable:$false] %s2218_s19 }
  0x23   : > { %s2220_s23 = scalar_lea.vmem %s2219_s19, 256  ;;  %p2221_p11 = scmp.lt.s32.totalorder %s2449_s30, %s2219_s19 }
  0x24   : > { %p2216_p4 = pnand %p2214_p2, %p2200_p3  ;;  %p2222_p5 = scmp.lt.s32.totalorder %s2220_s23, %s2213_s17 }
  0x26   : > { %p2217_p12 = pneg %p2216_p4  ;;  %p2223_p8 = por %p2222_p5, %p2221_p11 }
  0x28   : > { %p2224_p9 = pnand %p2223_p8, %p2217_p12 }
  0x2a   : > { %2227 = shalt.err (!%p2224_p9)
}
  0x2b   : > { %2110 = dma.hbm_to_vmem [thread:$0]  (!%p2445_p13), %s2441_s29, 128, %s2449_s30, %s363_s20  }
  0x2c   : > { %p2827_p0 = scmp.lt.s32.totalorder %s2294_s24, 3  ;;  %p2828_p1 = scmp.ge.s32.totalorder %s2294_s24, 1 }
  0x2e   : > { %p379_p3 = pnand %p2828_p1, %p2827_p0 }
  0x2f   : > { %s2483_s18 = sand.u32 (!%p379_p3), 1, %s2286_s22  }
  0x30   : > { %382 = sbr.rel (%p379_p3) target bundleno = 2541 (0x9ed), region = 68  ;;  %s1907_s28 = sshll.u32 (!%p379_p3), %s2483_s18, 3 }
  0x31   : > { %s385_s26 = scalar_lea.sflag (!%p379_p3), [#allocation3], %s2483_s18  ;;  %s388_s27 = scalar_lea.vmem (!%p379_p3), [#allocation2], %s1907_s28 }
  0x37   : > { %2273 = dma.done.wait (%p2421_p6), %s385_s26, 128  }
  0x38   : > { %2275 = vsyncadd (%p2421_p6), %s385_s26, 4294967168  ;;  %vm431_vm0 = vcmask 261120   ;;  %v2493_v0 = vld [vmem:[%s388_s27] sm:$0xff]  ;;  %v2297_v8 = vmov 0.0   ;;  %vm2298_vm1 = vmmov 0   ;;  %s2299_s26 = smov 80   ;;  %v561_v26 = vlaneseq }
  0x39   : > { %v432_v1 = vsel %vm431_vm0, %v2493_v0, 0.0  ;;  %v2164_v7 = vld [vmem:[%s2805_s3] sm:$0xff]   ;;  %1995 = vmatprep.subr.bf16.mxu1 %v2297_v8  ;;  %1999 = vmatprep.mubr.msk.bf16.mxu1 %vm2298_vm1, %v2297_v8  ;;  %v2165_v9 = vld [vmem:[%s2805_s3 + $0x8] sm:$0xff]   ;;  %s2300_s27 = smov 96   ;;  %s2301_s30 = smov 88   ;;  %vm976_vm2 = vcmask 64512  }
  0x3a   : > { %433 = vadd.xlane.f32.xlu0 %v432_v1  ;;  %1996 = vmatpush3.bf16.msra.mxu1 %v2164_v7  ;;  %v1909_v14 = vld [vmem:[%s2803_s1] ss:$0 sm:$0xff]  ;;  %s2302_s29 = smov 72   ;;  %s2303_s14 = smov 120   ;;  %v2306_v24 = vmov 1983009808  }
  0x3b   : > { %2021 = vmatprep.subr.bf16.mxu0 %v2297_v8  ;;  %1997 = vmatprep.subr.bf16.mxu1 %v2297_v8  ;;  %v1910_v16 = vld [vmem:[%s2804_s2] ss:$0 sm:$0xff]  ;;  %s2304_s20 = smov 112   ;;  %s2305_s17 = smov 104   ;;  %v559_v25 = vunpack.c.l.s4 %v2306_v24  ;;  %v2307_v28 = vmov 1934713408  }
  0x3c   : > { %2023 = vmatprep.mubr.msk.bf16.mxu0 %vm2298_vm1, %v2297_v8  ;;  %v623_v29 = vunpack.c.l.s4 %v2307_v28  ;;  %v562_v31 = vshrl.u32 %v561_v26, 7  ;;  %s2308_s13 = smov 64   ;;  %s2309_s19 = smov 48   ;;  %vm1212_vm3 = vcmask 1043456  }
  0x3d   : > { %v560_v30 = vunpack.c.0.s8 %v559_v25  ;;  %s2310_s23 = smov 40   ;;  %p2829_p11 = scmp.ne.s32.totalorder %s2824_s15, 0 }
  0x3e   : > { %1998 = vmatpush3.bf16.msra.mxu1 %v2165_v9  ;;  %v624_v34 = vunpack.c.0.s8 %v623_v29 }
  0x3f   : > { %2003 = vmatprep.subr.bf16.mxu1 %v2297_v8  ;;  %v2531_v35 = vsub.s32 %v560_v30, %v562_v31 }
  0x40   : > { %v2533_v41 = vsub.s32 %v624_v34, %v562_v31 }
  0xc7   : > { %v434_v2 = vpop.xlane.xlu0 %433 }
  0xc8   : > { %v436_v3 = vmul.f32 0.03125, %v434_v2 }
  0xca   : > { %v437_v4 = vsub.f32 %v2493_v0, %v436_v3 }
  0xcc   : > { %v438_v5 = vmul.f32 %v437_v4, %v437_v4 }
  0xce   : > { %v439_v6 = vsel %vm431_vm0, %v438_v5, 0.0 }
  0xcf   : > { %440 = vadd.xlane.f32.xlu0 %v439_v6 }
 0x15c   : > { %v441_v10 = vpop.xlane.xlu0 %440 }
 0x15d   : > { %v442_v11 = vmul.f32 0.03125, %v441_v10 }
 0x15f   : > { %v443_v12 = vadd.f32 1e-05, %v442_v11 }
 0x161   : > { %2176 = vrsqrt.f32 %v443_v12 }
 0x16b   : > { %v2177_v13 = vpop.eup %2176 }
 0x16c   : > { %v445_v15 = vmul.f32 %v2177_v13, %v437_v4 }
 0x16e   : > { %v453_v17 = vmul.f32 %v1909_v14, %v445_v15 }
 0x170   : > { %v461_v18 = vadd.f32 %v1910_v16, %v453_v17 }
 0x172   : > { %v462_v19 = vpack.c.bf16 %v461_v18, %v461_v18 }
 0x174   : > { %2000 = vmatmul.mubr.msk.bf16.vlgmr.msra.gmra.mrb[0].mxu1 %vm431_vm0, %v462_v19 }
 0x175   : > { %2005 = vmatprep.mubr.msk.bf16.mxu1 %vm2298_vm1, %v2297_v8 }
 0x247   : > { %v2522_v20 = vpop.f32.mrb[0].mxu1 }
 0x248   : > { %538 = vrot.lane.b32.xlu0 %v2522_v20, %s2299_s26  ;;  %532 = vrot.lane.b32.xlu1 %v2522_v20, %s2300_s27  ;;  %v2001_v21 = vpop.f32.mrb[1].mxu1  ;;  %s2311_s26 = smov 56  }
 0x249   : > { %v519_v22 = vpop.f32.mrb[2].mxu1 }
 0x24a   : > { %v2002_v23 = vpop.f32.mrb[3].mxu1 }
 0x24c   : > { %535 = vrot.lane.b32.xlu1 %v2522_v20, %s2301_s30 }
 0x250   : > { %541 = vrot.lane.b32.xlu1 %v2522_v20, %s2302_s29 }
 0x254   : > { %523 = vrot.lane.b32.xlu1 %v2522_v20, %s2303_s14 }
 0x258   : > { %526 = vrot.lane.b32.xlu1 %v2522_v20, %s2304_s20  ;;  %s2312_s20 = smov [#allocation5]  }
 0x25c   : > { %529 = vrot.lane.b32.xlu1 %v2522_v20, %s2305_s17  ;;  %s2232_s17 = sshll.u32 %s2312_s20, 4  ;;  %s2233_s17 = int_to_ptr.vmem [resolvable:$false] %s2232_s17 }
 0x2ba   : > { %v533_v27 = vpop.permute.xlu1 %532  ;;  %v539_v32 = vpop.permute.xlu0 %538 }
 0x2bb   : > { %v588_v36 = vcombine.low %v533_v27, %v539_v32  ;;  %v589_v37 = vcombine.high %v533_v27, %v539_v32 }
 0x2bd   : > { %v596_v42 = vrot.slane %v588_v36, %v2531_v35  ;;  %v603_v43 = vrot.slane %v589_v37, %v2531_v35 }
 0x2be   : > { %v536_v33 = vpop.permute.xlu1 %535 }
 0x2c2   : > { %v542_v38 = vpop.permute.xlu1 %541 }
 0x2c3   : > { %v604_v39 = vcombine.low %v536_v33, %v542_v38  ;;  %v605_v40 = vcombine.high %v536_v33, %v542_v38 }
 0x2c5   : > { %v612_v44 = vrot.slane %v604_v39, %v2531_v35  ;;  %v619_v45 = vrot.slane %v605_v40, %v2531_v35 }
 0x2c6   : > { %v524_v46 = vpop.permute.xlu1 %523 }
 0x2c7   : > { %v652_v47 = vcombine.low %v596_v42, %v612_v44  ;;  %v653_v48 = vcombine.high %v596_v42, %v612_v44  ;;  %v668_v49 = vcombine.low %v603_v43, %v619_v45  ;;  %v669_v50 = vcombine.high %v603_v43, %v619_v45 }
 0x2c9   : > { %v660_v51 = vrot.slane %v652_v47, %v2533_v41  ;;  %v667_v52 = vrot.slane %v653_v48, %v2533_v41  ;;  %v676_v53 = vrot.slane %v668_v49, %v2533_v41  ;;  %v683_v54 = vrot.slane %v669_v50, %v2533_v41 }
 0x2ca   : > { %v527_v55 = vpop.permute.xlu1 %526 }
 0x2cb   : > { %v1915_v56 = vcombine.low %v660_v51, %v667_v52  ;;  %v1917_v57 = vcombine.high %v660_v51, %v667_v52  ;;  %v1919_v58 = vcombine.low %v676_v53, %v683_v54  ;;  %v1921_v59 = vcombine.high %v676_v53, %v683_v54 }
 0x2cc   : > { %v556_v60 = vcombine.low %v2522_v20, %v527_v55  ;;  %v557_v61 = vcombine.high %v2522_v20, %v527_v55 }
 0x2cd   : > { %v775_v62 = vrot.slane %v1915_v56, %v2531_v35  ;;  %v791_v63 = vrot.slane %v1917_v57, %v2531_v35  ;;  %v807_v1 = vrot.slane %v1919_v58, %v2531_v35  ;;  %v823_v2 = vrot.slane %v1921_v59, %v2531_v35 }
 0x2ce   : > { %v530_v3 = vpop.permute.xlu1 %529  ;;  %v564_v9 = vrot.slane %v556_v60, %v2531_v35  ;;  %v571_v10 = vrot.slane %v557_v61, %v2531_v35 }
 0x2cf   : > { %v572_v4 = vcombine.low %v524_v46, %v530_v3  ;;  %v573_v5 = vcombine.high %v524_v46, %v530_v3  ;;  %v840_v6 = vcombine.low %v775_v62, %v791_v63  ;;  %v872_v7 = vcombine.low %v807_v1, %v823_v2 }
 0x2d0   : > { %v841_v11 = vcombine.high %v775_v62, %v791_v63  ;;  %v873_v12 = vcombine.high %v807_v1, %v823_v2 }
 0x2d1   : > { %v580_v13 = vrot.slane %v572_v4, %v2531_v35  ;;  %v587_v14 = vrot.slane %v573_v5, %v2531_v35  ;;  %v848_v15 = vrot.slane %v840_v6, %v2533_v41  ;;  %v880_v16 = vrot.slane %v872_v7, %v2533_v41 }
 0x2d2   : > { %v855_v17 = vrot.slane %v841_v11, %v2533_v41  ;;  %v887_v18 = vrot.slane %v873_v12, %v2533_v41 }
 0x2d3   : > { %v620_v19 = vcombine.low %v564_v9, %v580_v13  ;;  %v621_v21 = vcombine.high %v564_v9, %v580_v13  ;;  %v636_v22 = vcombine.low %v571_v10, %v587_v14  ;;  %v637_v23 = vcombine.high %v571_v10, %v587_v14 }
 0x2d4   : > { %v892_v24 = vcombine.low %v848_v15, %v880_v16  ;;  %v895_v25 = vcombine.high %v855_v17, %v887_v18  ;;  %v893_v44 = vcombine.high %v848_v15, %v880_v16  ;;  %v894_v59 = vcombine.low %v855_v17, %v887_v18 }
 0x2d5   : > { %v628_v26 = vrot.slane %v620_v19, %v2533_v41  ;;  %v635_v27 = vrot.slane %v621_v21, %v2533_v41  ;;  %v644_v28 = vrot.slane %v636_v22, %v2533_v41  ;;  %v651_v29 = vrot.slane %v637_v23, %v2533_v41 }
 0x2d6   : > { %v968_v30 = vpack.c.bf16 %v892_v24, %v892_v24  ;;  %v971_v31 = vpack.c.bf16 %v895_v25, %v895_v25  ;;  %v969_v54 = vpack.c.bf16 %v893_v44, %v893_v44  ;;  %v970_v61 = vpack.c.bf16 %v894_v59, %v894_v59 }
 0x2d7   : > { %v1914_v32 = vcombine.low %v628_v26, %v635_v27  ;;  %v1916_v33 = vcombine.high %v628_v26, %v635_v27  ;;  %v1918_v34 = vcombine.low %v644_v28, %v651_v29  ;;  %v1920_v36 = vcombine.high %v644_v28, %v651_v29 }
 0x2d8   : > { %v981_v37 = vsel %vm976_vm2, %v968_v30, 0  ;;  %v1119_v38 = vsel %vm976_vm2, %v971_v31, 0  ;;  %v1027_v58 = vsel %vm976_vm2, %v969_v54, 0  ;;  %v1073_v63 = vsel %vm976_vm2, %v970_v61, 0 }
 0x2d9   : > { %v768_v39 = vrot.slane %v1914_v32, %v2531_v35  ;;  %v784_v40 = vrot.slane %v1916_v33, %v2531_v35  ;;  %v800_v42 = vrot.slane %v1918_v34, %v2531_v35  ;;  %v816_v43 = vrot.slane %v1920_v36, %v2531_v35  ;;  %2004 = vmatpush3.bf16.xpose.msra.mxu1 %v981_v37 }
 0x2da   : > { %2022 = vmatpush3.bf16.xpose.msra.mxu0 %v1119_v38  ;;  %2009 = vmatprep.subr.bf16.mxu1 %v2297_v8 }
 0x2db   : > { %v824_v45 = vcombine.low %v768_v39, %v784_v40  ;;  %v856_v46 = vcombine.low %v800_v42, %v816_v43  ;;  %v825_v47 = vcombine.high %v768_v39, %v784_v40  ;;  %v857_v48 = vcombine.high %v800_v42, %v816_v43  ;;  %2033 = vmatprep.subr.bf16.mxu0 %v2297_v8 }
 0x2dd   : > { %v832_v49 = vrot.slane %v824_v45, %v2533_v41  ;;  %v864_v50 = vrot.slane %v856_v46, %v2533_v41  ;;  %v839_v51 = vrot.slane %v825_v47, %v2533_v41  ;;  %v871_v52 = vrot.slane %v857_v48, %v2533_v41 }
 0x2df   : > { %v888_v53 = vcombine.low %v832_v49, %v864_v50  ;;  %v891_v55 = vcombine.high %v839_v51, %v871_v52  ;;  %v889_v60 = vcombine.high %v832_v49, %v864_v50  ;;  %v890_v1 = vcombine.low %v839_v51, %v871_v52 }
 0x2e1   : > { %v964_v56 = vpack.c.bf16 %v888_v53, %v888_v53  ;;  %v967_v57 = vpack.c.bf16 %v891_v55, %v891_v55  ;;  %v965_v62 = vpack.c.bf16 %v889_v60, %v889_v60  ;;  %v966_v2 = vpack.c.bf16 %v890_v1, %v890_v1 }
 0x2e3   : > { %2006 = vmatmul.mubr.msk.bf16.vlgmr.msra.gmra.mrb[4].mxu1 %vm976_vm2, %v964_v56  ;;  %2024 = vmatmul.mubr.msk.bf16.vlgmr.msra.gmra.mrb[0].mxu0 %vm976_vm2, %v967_v57 }
 0x2e4   : > { %2010 = vmatpush3.bf16.xpose.msra.mxu1 %v1027_v58  ;;  %2011 = vmatprep.mubr.msk.bf16.mxu1 %vm2298_vm1, %v2297_v8 }
 0x2e5   : > { %2015 = vmatprep.subr.bf16.mxu1 %v2297_v8  ;;  %2035 = vmatprep.mubr.msk.bf16.mxu0 %vm2298_vm1, %v2297_v8 }
 0x2eb   : > { %2012 = vmatmul.mubr.msk.bf16.vlgmr.msra.gmra.mrb[8].mxu1 %vm976_vm2, %v965_v62 }
 0x2ec   : > { %2016 = vmatpush3.bf16.xpose.msra.mxu1 %v1073_v63  ;;  %2017 = vmatprep.mubr.msk.bf16.mxu1 %vm2298_vm1, %v2297_v8 }
 0x2ed   : > { %2027 = vmatprep.subr.bf16.mxu1 %v2297_v8 }
 0x2f3   : > { %2018 = vmatmul.mubr.msk.bf16.vlgmr.msra.gmra.mrb[12].mxu1 %vm976_vm2, %v966_v2 }
 0x2f4   : > { %2029 = vmatprep.mubr.msk.bf16.mxu1 %vm2298_vm1, %v2297_v8 }
 0x3b6   : > { %v1017_v3 = vpop.f32.mrb[4].mxu1  ;;  %v1155_v4 = vpop.f32.mrb[0].mxu0 }
 0x3b7   : > { %v2007_v5 = vpop.f32.mrb[5].mxu1  ;;  %v2025_v6 = vpop.f32.mrb[1].mxu0  ;;  %v1161_v7 = vsel %vm976_vm2, %v1017_v3, -inf  ;;  %v1170_v18 = vsel %vm976_vm2, %v1155_v4, -inf }
 0x3b8   : > { %v1158_v9 = vpop.f32.mrb[2].mxu0  ;;  %1162 = vmax.xlane.f32.xlu1 %v1161_v7  ;;  %v1020_v10 = vpop.f32.mrb[6].mxu1 }
 0x3b9   : > { %v2008_v11 = vpop.f32.mrb[7].mxu1  ;;  %v2026_v12 = vpop.f32.mrb[3].mxu0 }
 0x3be   : > { %v1063_v13 = vpop.f32.mrb[8].mxu1 }
 0x3bf   : > { %v2013_v14 = vpop.f32.mrb[9].mxu1  ;;  %v1164_v15 = vsel %vm976_vm2, %v1063_v13, -inf }
 0x3c0   : > { %1165 = vmax.xlane.f32.xlu0 %v1164_v15  ;;  %v1066_v16 = vpop.f32.mrb[10].mxu1 }
 0x3c1   : > { %v2014_v17 = vpop.f32.mrb[11].mxu1 }
 0x3c4   : > { %1171 = vmax.xlane.f32.xlu0 %v1170_v18 }
 0x3c6   : > { %v1109_v19 = vpop.f32.mrb[12].mxu1 }
 0x3c7   : > { %v2019_v21 = vpop.f32.mrb[13].mxu1  ;;  %v1167_v22 = vsel %vm976_vm2, %v1109_v19, -inf }
 0x3c8   : > { %1168 = vmax.xlane.f32.xlu1 %v1167_v22  ;;  %v1112_v23 = vpop.f32.mrb[14].mxu1 }
 0x3c9   : > { %v2020_v24 = vpop.f32.mrb[15].mxu1 }
 0x3d9   : > { %544 = vrot.lane.b32.xlu1 %v2522_v20, %s2308_s13  ;;  %s2234_s13 = scalar_lea.vmem %s2233_s17, 256 }
 0x445   : > { %v1163_v25 = vpop.xlane.xlu1 %1162 }
 0x446   : > { %v1173_v26 = vsub.f32 %v1017_v3, %v1163_v25 }
 0x448   : > { %v1177_v27 = vmul.f32 1.442695, %v1173_v26 }
 0x44a   : > { %2178 = vpow2.f32 %v1177_v27 }
 0x44d   : > { %v1166_v28 = vpop.xlane.xlu0 %1165 }
 0x44e   : > { %v1174_v29 = vsub.f32 %v1063_v13, %v1166_v28 }
 0x450   : > { %v1179_v30 = vmul.f32 1.442695, %v1174_v29 }
 0x451   : > { %v1172_v36 = vpop.xlane.xlu0 %1171 }
 0x452   : > { %2180 = vpow2.f32 %v1179_v30  ;;  %v1176_v37 = vsub.f32 %v1155_v4, %v1172_v36 }
 0x454   : > { %v2594_v31 = vpop.eup %2178  ;;  %v1183_v39 = vmul.f32 1.442695, %v1176_v37 }
 0x455   : > { %v1185_v32 = vsel %vm976_vm2, %v2594_v31, 0.0  ;;  %v1169_v38 = vpop.xlane.xlu1 %1168 }
 0x456   : > { %1186 = vadd.xlane.f32.xlu1 %v1185_v32  ;;  %v1175_v40 = vsub.f32 %v1109_v19, %v1169_v38  ;;  %2182 = vpow2.f32 %v1183_v39 }
 0x458   : > { %v1181_v42 = vmul.f32 1.442695, %v1175_v40 }
 0x45a   : > { %2184 = vpow2.f32 %v1181_v42 }
 0x45c   : > { %v2598_v33 = vpop.eup %2180 }
 0x45d   : > { %v1188_v34 = vsel %vm976_vm2, %v2598_v33, 0.0 }
 0x45e   : > { %1189 = vadd.xlane.f32.xlu0 %v1188_v34 }
 0x460   : > { %v2605_v43 = vpop.eup %2182 }
 0x461   : > { %v1194_v44 = vsel %vm976_vm2, %v2605_v43, 0.0 }
 0x464   : > { %v2609_v45 = vpop.eup %2184 }
 0x465   : > { %v1191_v46 = vsel %vm976_vm2, %v2609_v45, 0.0 }
 0x467   : > { %550 = vrot.lane.b32.xlu1 %v2522_v20, %s2309_s19 }
 0x46b   : > { %553 = vrot.lane.b32.xlu1 %v2522_v20, %s2310_s23  ;;  %s1953_s23 = sshll.u32 %s2399_s25, 7  ;;  %s1818_s25 = scalar_lea.sflag [#allocation4], %s2483_s18 }
 0x46c   : > { %s2757_s14 = scalar_lea.hbm %s2814_s12, %s1953_s23 }
 0x474   : > { %547 = vrot.lane.b32.xlu0 %v2522_v20, %s2311_s26  ;;  %v545_v20 = vpop.permute.xlu1 %544  ;;  %s428_s26 = scalar_lea.vmem [#allocation5], %s1907_s28 }
 0x475   : > { %s1831_s27 = sshll.u32 %s428_s26, 4  ;;  %s2759_s27 = int_to_ptr.vmem [resolvable:$true] %s1831_s27 }
 0x476   : > { %s2228_s28 = scalar_lea.vmem %s2759_s27, 128  ;;  %p2235_p7 = scmp.lt.s32.totalorder %s2759_s27, %s2233_s17 }
 0x477   : > { %p2229_p6 = scmp.ne.s32.totalorder %s2759_s27, %s2228_s28  ;;  %p2236_p10 = scmp.lt.s32.totalorder %s2234_s13, %s2228_s28 }
 0x479   : > { %p2230_p12 = pnand %p2229_p6, %p2829_p11  ;;  %p2237_p2 = por %p2236_p10, %p2235_p7 }
 0x47b   : > { %p2231_p13 = pneg %p2230_p12 }
 0x47d   : > { %p2238_p4 = pnand %p2237_p2, %p2231_p13 }
 0x48f   : > { %1195 = vadd.xlane.f32.xlu1 %v1194_v44 }
 0x493   : > { %1192 = vadd.xlane.f32.xlu0 %v1191_v46 }
 0x4e3   : > { %v1187_v47 = vpop.xlane.xlu1 %1186 }
 0x4e4   : > { %2186 = vrcp.f32 %v1187_v47 }
 0x4e7   : > { %v551_v48 = vpop.permute.xlu1 %550 }
 0x4e8   : > { %v692_v50 = vcombine.low %v545_v20, %v551_v48  ;;  %v693_v51 = vcombine.high %v545_v20, %v551_v48 }
 0x4ea   : > { %v700_v56 = vrot.slane %v692_v50, %v2531_v35  ;;  %v707_v57 = vrot.slane %v693_v51, %v2531_v35  ;;  %v1398_v50 = vld [vmem:[%s2806_s4] sm:$0xf] }
 0x4eb   : > { %v1190_v49 = vpop.xlane.xlu0 %1189  ;;  %v554_v52 = vpop.permute.xlu1 %553 }
 0x4ec   : > { %2188 = vrcp.f32 %v1190_v49 }
 0x4ee   : > { %v2187_v18 = vpop.eup %2186 }
 0x4ef   : > { %v548_v53 = vpop.permute.xlu0 %547 }
 0x4f0   : > { %v708_v54 = vcombine.low %v548_v53, %v554_v52  ;;  %v709_v55 = vcombine.high %v548_v53, %v554_v52  ;;  %v1400_v52 = vld [vmem:[%s2806_s4 + $0x8] sm:$0xf]  ;;  %v1401_v53 = vld [vmem:[%s2806_s4 + $0xc] sm:$0xf] }
 0x4f2   : > { %v716_v58 = vrot.slane %v708_v54, %v2531_v35  ;;  %v723_v59 = vrot.slane %v709_v55, %v2531_v35 }
 0x4f4   : > { %v724_v60 = vcombine.low %v700_v56, %v716_v58  ;;  %v725_v61 = vcombine.high %v700_v56, %v716_v58  ;;  %v740_v62 = vcombine.low %v707_v57, %v723_v59  ;;  %v741_v63 = vcombine.high %v707_v57, %v723_v59 }
 0x4f6   : > { %v732_v1 = vrot.slane %v724_v60, %v2533_v41  ;;  %v739_v2 = vrot.slane %v725_v61, %v2533_v41  ;;  %v748_v3 = vrot.slane %v740_v62, %v2533_v41  ;;  %v755_v4 = vrot.slane %v741_v63, %v2533_v41  ;;  %v2189_v24 = vpop.eup %2188 }
 0x4f7   : > { %v1202_v29 = vmul.f32 %v2189_v24, %v2598_v33  ;;  %v1498_v60 = vsel %vm1212_vm3, %v1400_v52, 0  ;;  %v1544_v61 = vsel %vm1212_vm3, %v1401_v53, 0 }
 0x4f8   : > { %v896_v5 = vcombine.low %v732_v1, %v739_v2  ;;  %v1922_v6 = vcombine.high %v732_v1, %v739_v2  ;;  %v912_v7 = vcombine.low %v748_v3, %v755_v4  ;;  %v1923_v9 = vcombine.high %v748_v3, %v755_v4 }
 0x4f9   : > { %v1206_v39 = vpack.c.bf16 %v1202_v29, %v1202_v29 }
 0x4fa   : > { %v903_v10 = vrot.slane %v896_v5, %v2531_v35  ;;  %v911_v11 = vrot.slane %v1922_v6, %v2531_v35  ;;  %v919_v12 = vrot.slane %v912_v7, %v2531_v35  ;;  %v927_v13 = vrot.slane %v1923_v9, %v2531_v35 }
 0x4fb   : > { %v1201_v35 = vmul.f32 %v2187_v18, %v2594_v31 }
 0x4fc   : > { %v928_v14 = vcombine.low %v903_v10, %v911_v11  ;;  %v944_v15 = vcombine.low %v919_v12, %v927_v13  ;;  %v929_v16 = vcombine.high %v903_v10, %v911_v11  ;;  %v945_v17 = vcombine.high %v919_v12, %v927_v13 }
 0x4fe   : > { %v936_v19 = vrot.slane %v928_v14, %v2533_v41  ;;  %v952_v21 = vrot.slane %v944_v15, %v2533_v41  ;;  %v943_v22 = vrot.slane %v929_v16, %v2533_v41  ;;  %v959_v23 = vrot.slane %v945_v17, %v2533_v41 }
 0x4ff   : > { %v1205_v41 = vpack.c.bf16 %v1201_v35, %v1201_v35 }
 0x500   : > { %v960_v25 = vcombine.low %v936_v19, %v952_v21  ;;  %v961_v26 = vcombine.high %v936_v19, %v952_v21  ;;  %v962_v27 = vcombine.low %v943_v22, %v959_v23  ;;  %v963_v28 = vcombine.high %v943_v22, %v959_v23 }
 0x502   : > { %v972_v30 = vpack.c.bf16 %v960_v25, %v960_v25  ;;  %v973_v32 = vpack.c.bf16 %v961_v26, %v961_v26  ;;  %v974_v37 = vpack.c.bf16 %v962_v27, %v962_v27  ;;  %v975_v38 = vpack.c.bf16 %v963_v28, %v963_v28 }
 0x504   : > { %v1214_v34 = vsel %vm1212_vm3, %v972_v30, 0  ;;  %v1260_v36 = vsel %vm1212_vm3, %v973_v32, 0  ;;  %v1306_v31 = vsel %vm1212_vm3, %v974_v37, 0  ;;  %v1352_v33 = vsel %vm1212_vm3, %v975_v38, 0  ;;  %v1936_v38 = vld [vmem:[%s2807_s5] ss:$0 sm:$0xff] }
 0x505   : > { %2028 = vmatpush3.bf16.msra.mxu1 %v1214_v34  ;;  %2034 = vmatpush3.bf16.msra.mxu0 %v1260_v36 }
 0x506   : > { %2039 = vmatprep.subr.bf16.mxu1 %v2297_v8  ;;  %2045 = vmatprep.subr.bf16.mxu0 %v2297_v8 }
 0x508   : > { %2030 = vmatmul.mubr.msk.bf16.vlgmr.msra.gmra.mrb[16].mxu1 %vm976_vm2, %v1205_v41  ;;  %2036 = vmatmul.mubr.msk.bf16.vlgmr.msra.gmra.mrb[4].mxu0 %vm976_vm2, %v1206_v39 }
 0x509   : > { %2040 = vmatpush3.bf16.msra.mxu1 %v1306_v31  ;;  %2046 = vmatpush3.bf16.msra.mxu0 %v1352_v33 }
 0x50a   : > { %2047 = vmatprep.mubr.msk.bf16.mxu0 %vm2298_vm1, %v2297_v8  ;;  %2041 = vmatprep.mubr.msk.bf16.mxu1 %vm2298_vm1, %v2297_v8 }
 0x50b   : > { %2051 = vmatprep.subr.bf16.mxu1 %v2297_v8  ;;  %2057 = vmatprep.subr.bf16.mxu0 %v2297_v8 }
 0x51c   : > { %v1196_v40 = vpop.xlane.xlu1 %1195 }
 0x51d   : > { %2190 = vrcp.f32 %v1196_v40 }
 0x520   : > { %v1193_v42 = vpop.xlane.xlu0 %1192 }
 0x521   : > { %2192 = vrcp.f32 %v1193_v42 }
 0x527   : > { %v2191_v44 = vpop.eup %2190 }
 0x528   : > { %v1204_v46 = vmul.f32 %v2191_v44, %v2605_v43  ;;  %v1399_v43 = vld [vmem:[%s2806_s4 + $0x4] sm:$0xf] }
 0x529   : > { %v1452_v51 = vsel %vm1212_vm3, %v1399_v43, 0  ;;  %v2170_v43 = vld [vmem:[%s2812_s10 + $0x10] sm:$0xff]  }
 0x52a   : > { %v1208_v20 = vpack.c.bf16 %v1204_v46, %v1204_v46 }
 0x52b   : > { %v2193_v47 = vpop.eup %2192 }
 0x52c   : > { %v1203_v48 = vmul.f32 %v2193_v47, %v2609_v45  ;;  %2048 = vmatmul.mubr.msk.bf16.vlgmr.msra.gmra.mrb[8].mxu0 %vm976_vm2, %v1208_v20  ;;  %v1406_v45 = vsel %vm1212_vm3, %v1398_v50, 0  ;;  %v2169_v50 = vld [vmem:[%s2812_s10 + $0x8] sm:$0xff]  }
 0x52d   : > { %2059 = vmatprep.mubr.msk.bf16.mxu0 %vm2298_vm1, %v2297_v8  ;;  %2058 = vmatpush3.bf16.msra.mxu0 %v1452_v51 }
 0x52e   : > { %v1207_v49 = vpack.c.bf16 %v1203_v48, %v1203_v48  ;;  %2069 = vmatprep.subr.bf16.mxu0 %v2297_v8  ;;  %v2166_v48 = vld [vmem:[%s2810_s8] sm:$0xff]  }
 0x530   : > { %2042 = vmatmul.mubr.msk.bf16.vlgmr.msra.gmra.mrb[20].mxu1 %vm976_vm2, %v1207_v49  ;;  %v2168_v49 = vld [vmem:[%s2812_s10] sm:$0xff]  }
 0x531   : > { %2053 = vmatprep.mubr.msk.bf16.mxu1 %vm2298_vm1, %v2297_v8  ;;  %2052 = vmatpush3.bf16.msra.mxu1 %v1406_v45 }
 0x532   : > { %2063 = vmatprep.subr.bf16.mxu1 %v2297_v8 }
 0x5db   : > { %v1250_v54 = vpop.f32.mrb[16].mxu1  ;;  %v1296_v55 = vpop.f32.mrb[4].mxu0 }
 0x5dc   : > { %v1394_v56 = vpack.c.bf16 %v1250_v54, %v1250_v54  ;;  %v1395_v57 = vpack.c.bf16 %v1296_v55, %v1296_v55  ;;  %v2031_v58 = vpop.f32.mrb[17].mxu1  ;;  %v2037_v59 = vpop.f32.mrb[5].mxu0  ;;  %v1937_v54 = vld [vmem:[%s2808_s6] ss:$0 sm:$0xff] }
 0x5dd   : > { %v1253_v62 = vpop.f32.mrb[18].mxu1  ;;  %v1299_v63 = vpop.f32.mrb[6].mxu0 }
 0x5de   : > { %v2032_v1 = vpop.f32.mrb[19].mxu1  ;;  %v2038_v2 = vpop.f32.mrb[7].mxu0  ;;  %2054 = vmatmul.mubr.msk.bf16.vlgmr.msra.gmra.mrb[24].mxu1 %vm976_vm2, %v1394_v56  ;;  %2060 = vmatmul.mubr.msk.bf16.vlgmr.msra.gmra.mrb[12].mxu0 %vm976_vm2, %v1395_v57  ;;  %v1938_v56 = vld [vmem:[%s2809_s7] ss:$0 sm:$0xff]  ;;  %v2173_v62 = vld [vmem:[%s2812_s10 + $0x28] sm:$0xff]   ;;  %v2174_v63 = vld [vmem:[%s2812_s10 + $0x30] sm:$0xff]  }
 0x5df   : > { %2064 = vmatpush3.bf16.msra.mxu1 %v1498_v60  ;;  %2070 = vmatpush3.bf16.msra.mxu0 %v1544_v61  ;;  %v2171_v60 = vld [vmem:[%s2812_s10 + $0x18] sm:$0xff]   ;;  %v2172_v61 = vld [vmem:[%s2812_s10 + $0x20] sm:$0xff]  }
 0x5e0   : > { %2071 = vmatprep.mubr.msk.bf16.mxu0 %vm2298_vm1, %v2297_v8  ;;  %2065 = vmatprep.mubr.msk.bf16.mxu1 %vm2298_vm1, %v2297_v8  ;;  %v2175_v1 = vld [vmem:[%s2812_s10 + $0x38] sm:$0xff]   ;;  %v1939_v2 = vld [vmem:[%s2811_s9] ss:$0 sm:$0xff] }
 0x5e1   : > { %2075 = vmatprep.subr.bf16.mxu1 %v2297_v8  ;;  %2083 = vmatprep.subr.bf16.mxu0 %v2297_v8 }
 0x5ff   : > { %v1388_v3 = vpop.f32.mrb[8].mxu0 }
 0x600   : > { %v1397_v4 = vpack.c.bf16 %v1388_v3, %v1388_v3  ;;  %v2049_v5 = vpop.f32.mrb[9].mxu0 }
 0x601   : > { %v1391_v6 = vpop.f32.mrb[10].mxu0 }
 0x602   : > { %v2050_v7 = vpop.f32.mrb[11].mxu0  ;;  %2072 = vmatmul.mubr.msk.bf16.vlgmr.msra.gmra.mrb[16].mxu0 %vm976_vm2, %v1397_v4 }
 0x603   : > { %v1342_v9 = vpop.f32.mrb[20].mxu1  ;;  %2099 = vmatprep.mubr.msk.bf16.mxu0 %vm2298_vm1, %v2297_v8  ;;  %2084 = vmatpush3.bf16.msra.mxu0 %v2168_v49 }
 0x604   : > { %v1396_v10 = vpack.c.bf16 %v1342_v9, %v1342_v9  ;;  %v2043_v11 = vpop.f32.mrb[21].mxu1  ;;  %2085 = vmatprep.subr.bf16.mxu0 %v2297_v8 }
 0x605   : > { %v1345_v12 = vpop.f32.mrb[22].mxu1 }
 0x606   : > { %v2044_v13 = vpop.f32.mrb[23].mxu1  ;;  %2066 = vmatmul.mubr.msk.bf16.vlgmr.msra.gmra.mrb[28].mxu1 %vm976_vm2, %v1396_v10 }
 0x607   : > { %2079 = vmatprep.mubr.msk.bf16.mxu1 %vm2298_vm1, %v2297_v8  ;;  %2076 = vmatpush3.bf16.msra.mxu1 %v2166_v48 }
 0x608   : > { %2077 = vmatprep.subr.bf16.mxu1 %v2297_v8  ;;  %2086 = vmatpush3.bf16.msra.mxu0 %v2169_v50 }
 0x609   : > { %2087 = vmatprep.subr.bf16.mxu0 %v2297_v8 }
 0x60c   : > { %2088 = vmatpush3.bf16.msra.mxu0 %v2170_v43 }
 0x60d   : > { %2089 = vmatprep.subr.bf16.mxu0 %v2297_v8 }
 0x610   : > { %2090 = vmatpush3.bf16.msra.mxu0 %v2171_v60 }
 0x611   : > { %2091 = vmatprep.subr.bf16.mxu0 %v2297_v8 }
 0x614   : > { %2092 = vmatpush3.bf16.msra.mxu0 %v2172_v61 }
 0x615   : > { %2093 = vmatprep.subr.bf16.mxu0 %v2297_v8 }
 0x618   : > { %2094 = vmatpush3.bf16.msra.mxu0 %v2173_v62 }
 0x619   : > { %2095 = vmatprep.subr.bf16.mxu0 %v2297_v8 }
 0x61c   : > { %2096 = vmatpush3.bf16.msra.mxu0 %v2174_v63 }
 0x61d   : > { %2097 = vmatprep.subr.bf16.mxu0 %v2297_v8 }
 0x620   : > { %2098 = vmatpush3.bf16.msra.mxu0 %v2175_v1 }
 0x6b1   : > { %v1442_v14 = vpop.f32.mrb[24].mxu1  ;;  %v1488_v15 = vpop.f32.mrb[12].mxu0 }
 0x6b2   : > { %v1586_v16 = vsel %vm431_vm0, %v1442_v14, 0.0  ;;  %v1587_v17 = vsel %vm431_vm0, %v1488_v15, 0.0  ;;  %v2055_v18 = vpop.f32.mrb[25].mxu1  ;;  %v2061_v19 = vpop.f32.mrb[13].mxu0  ;;  %v1943_v14 = vld [vmem:[%s2813_s11] ss:$0 sm:$0xff] }
 0x6b3   : > { %v1588_v21 = vadd.f32 %v1587_v17, %v1586_v16  ;;  %v1445_v22 = vpop.f32.mrb[26].mxu1  ;;  %v1491_v23 = vpop.f32.mrb[14].mxu0 }
 0x6b4   : > { %v2056_v24 = vpop.f32.mrb[27].mxu1  ;;  %v2062_v25 = vpop.f32.mrb[15].mxu0 }
 0x6d5   : > { %v1580_v26 = vpop.f32.mrb[16].mxu0 }
 0x6d6   : > { %v2073_v27 = vpop.f32.mrb[17].mxu0  ;;  %v1591_v37 = vsel %vm431_vm0, %v1580_v26, 0.0 }
 0x6d7   : > { %v1583_v28 = vpop.f32.mrb[18].mxu0 }
 0x6d8   : > { %v2074_v35 = vpop.f32.mrb[19].mxu0 }
 0x6d9   : > { %v1534_v29 = vpop.f32.mrb[28].mxu1 }
 0x6da   : > { %v1589_v30 = vsel %vm431_vm0, %v1534_v29, 0.0  ;;  %v2067_v32 = vpop.f32.mrb[29].mxu1 }
 0x6db   : > { %v1590_v34 = vadd.f32 %v1589_v30, %v1588_v21  ;;  %v1537_v36 = vpop.f32.mrb[30].mxu1 }
 0x6dc   : > { %v2068_v41 = vpop.f32.mrb[31].mxu1 }
 0x6dd   : > { %v1592_v39 = vadd.f32 %v1591_v37, %v1590_v34 }
 0x6df   : > { %v1600_v31 = vadd.f32 %v1936_v38, %v1592_v39 }
 0x6e1   : > { %v2693_v33 = vadd.f32 %v1600_v31, %v2493_v0  ;;  %v2167_v0 = vld [vmem:[%s2810_s8 + $0x8] sm:$0xff]  }
 0x6e2   : > { %2078 = vmatpush3.bf16.msra.mxu1 %v2167_v0 }
 0x6e3   : > { %v1602_v40 = vsel %vm431_vm0, %v2693_v33, 0.0 }
 0x6e4   : > { %1603 = vadd.xlane.f32.xlu0 %v1602_v40 }
 0x771   : > { %v1604_v42 = vpop.xlane.xlu0 %1603 }
 0x772   : > { %v1605_v44 = vmul.f32 0.03125, %v1604_v42 }
 0x774   : > { %v1606_v46 = vsub.f32 %v2693_v33, %v1605_v44 }
 0x776   : > { %v1607_v20 = vmul.f32 %v1606_v46, %v1606_v46 }
 0x778   : > { %v1608_v47 = vsel %vm431_vm0, %v1607_v20, 0.0 }
 0x779   : > { %1609 = vadd.xlane.f32.xlu0 %v1608_v47 }
 0x806   : > { %v1610_v45 = vpop.xlane.xlu0 %1609 }
 0x807   : > { %v1611_v51 = vmul.f32 0.03125, %v1610_v45 }
 0x809   : > { %v1612_v52 = vadd.f32 1e-05, %v1611_v51 }
 0x80b   : > { %2194 = vrsqrt.f32 %v1612_v52 }
 0x815   : > { %v2195_v53 = vpop.eup %2194 }
 0x816   : > { %v1614_v55 = vmul.f32 %v2195_v53, %v1606_v46 }
 0x818   : > { %v1622_v57 = vmul.f32 %v1937_v54, %v1614_v55 }
 0x81a   : > { %v1630_v58 = vadd.f32 %v1938_v56, %v1622_v57 }
 0x81c   : > { %v1631_v59 = vpack.c.bf16 %v1630_v58, %v1630_v58 }
 0x81e   : > { %2080 = vmatmul.mubr.msk.bf16.vlgmr.msra.gmra.mrb[32].mxu1 %vm431_vm0, %v1631_v59 }
 0x8f1   : > { %v1692_v3 = vpop.f32.mrb[32].mxu1 }
 0x8f2   : > { %v1693_v4 = vadd.f32 %v1939_v2, %v1692_v3  ;;  %v2081_v5 = vpop.f32.mrb[33].mxu1 }
 0x8f3   : > { %v1695_v6 = vpop.f32.mrb[34].mxu1 }
 0x8f4   : > { %v1699_v7 = vmul.f32 0.70710677, %v1693_v4  ;;  %v2082_v9 = vpop.f32.mrb[35].mxu1  ;;  %v1698_v8 = vmul.f32 0.5, %v1693_v4 }
 0x8f6   : > { %2196 = verf.f32 %v1699_v7 }
 0x900   : > { %v2197_v10 = vpop.eup %2196 }
 0x901   : > { %v1701_v11 = vadd.f32 1.0, %v2197_v10 }
 0x903   : > { %v1702_v12 = vmul.f32 %v1701_v11, %v1698_v8 }
 0x905   : > { %v1703_v13 = vpack.c.bf16 %v1702_v12, %v1702_v12 }
 0x907   : > { %2100 = vmatmul.mubr.bf16.vlgmr.msra.gmra.mrb[20].mxu0 %v1703_v13 }
 0x9da   : > { %v1809_v15 = vpop.f32.mrb[20].mxu0 }
 0x9db   : > { %v1810_v16 = vadd.f32 %v1943_v14, %v1809_v15  ;;  %v2101_v17 = vpop.f32.mrb[21].mxu0 }
 0x9dc   : > { %v1812_v18 = vpop.f32.mrb[22].mxu0 }
 0x9dd   : > { %v1815_v19 = vadd.f32 %v1810_v16, %v2693_v33  ;;  %v2102_v21 = vpop.f32.mrb[23].mxu0 }
 0x9df   : > { %1816 = vst.msk [vmem:[%s428_s26] sm:$0xff] %vm431_vm0, %v1815_v19 }
 0x9e0   : > { %2241 = shalt.err (!%p2238_p4)
}
 0x9e1   : > { %s2242_s18 = scalar_lea.hbm %s2757_s14, 128  ;;  %s2246_s26 = scalar_lea.hbm %s2814_s12, 256 }
 0x9e2   : > { %p2243_p5 = scmp.ne.s32.totalorder %s2757_s14, %s2242_s18  ;;  %p2247_p0 = scmp.lt.u32.totalorder %s2757_s14, %s2814_s12 }
 0x9e3   : > { %p2248_p1 = scmp.lt.u32.totalorder %s2246_s26, %s2242_s18  ;;  %p2250_p6 = scmp.lt.u32.totalorder %s2242_s18, %s2757_s14 }
 0x9e4   : > { %p2244_p8 = pnand %p2243_p5, %p2829_p11 }
 0x9e5   : > { %p2249_p3 = por %p2248_p1, %p2247_p0 }
 0x9e6   : > { %p2245_p9 = pneg %p2244_p8 }
 0x9e7   : > { %p2251_p12 = por %p2250_p6, %p2249_p3 }
 0x9e9   : > { %p2252_p13 = pnand %p2251_p12, %p2245_p9 }
 0x9eb   : > { %2255 = shalt.err (!%p2252_p13)
}
 0x9ec   : > { %2105 = dma.vmem_to_hbm [thread:$0]  (%p2829_p11), %s2759_s27, 128, %s2757_s14, %s1818_s25  }
 0x9ed PF: > { %s1843_s28 = sand.u32 1, %s2282_s21   ;;  %p2830_p7 = scmp.ne.s32.totalorder %s2825_s16, 0 }
 0x9ee   : > { %p2831_p10 = scmp.ge.s32.totalorder %s2294_s24, 2  ;;  %s1844_s20 = scalar_lea.sflag [#allocation4], %s1843_s28 }
 0x9f0   : > { %p2112_p2 = pnand %p2831_p10, %p2830_p7 }
 0x9f2   : > { %2277 = dma.done.wait (!%p2112_p2), %s1844_s20, 128  }
 0x9f3   : > { %2279 = vsyncadd (!%p2112_p2), %s1844_s20, 4294967168  ;;  %s2832_s24 = sld [smem:[#allocation9_spill]]  ;;  %s2833_s17 = sld [smem:[#allocation8_spill]] }
 0x9f4   : > { %s2834_s23 = sld [smem:[#allocation10_spill]]  ;;  %s2835_s21 = smov %s2286_s22 }
 0x9f9   : > { %p25_p4 = scmp.ge.s32.totalorder %s2832_s24, 4   ;;  %s2836_s22 = smov %s2833_s17 }
 0x9fb   :  { %27 = sbr.rel (!%p25_p4) target bundleno = 5 (0x5), region = 113 }
 0xa02   :  { %1849 = vsyncpa [#allocation3], 1 }
 0xa03   :  { %1851 = vsyncpa [#allocation3 + $0x1], 1 }
 0xa04   :  { %1852 = vsyncpa [#allocation4], 1 }
 0xa05   :  { %1854 = vsyncpa [#allocation4 + $0x1], 1 }

// kernel: tpu_custom_call.1
= control target key start
LH: loop header
LB: loop body
LE: loop exit
PB: predicated region body
PF: predicated region fallthrough
CT: control target
= control target key end

     0   :  { %17 = vsyncpa [#allocation3], 0  ;;  %s2802_s0 = inlined_call_operand.hbm [shape: f32[2,8,32], index: 0, kind: input, shape index: {}, may-alias: {0,12}]   ;;  %s2803_s1 = inlined_call_operand.vmem [shape: f32[1,32], index: 1, kind: input, shape index: {}]   ;;  %s2804_s2 = inlined_call_operand.vmem [shape: f32[1,32], index: 2, kind: input, shape index: {}]   ;;  %s2805_s3 = inlined_call_operand.vmem [shape: bf16[32,96], index: 3, kind: input, shape index: {}]   ;;  %s2806_s4 = inlined_call_operand.vmem [shape: bf16[4,8,32], index: 4, kind: input, shape index: {}]   ;;  %s2807_s5 = inlined_call_operand.vmem [shape: f32[1,32], index: 5, kind: input, shape index: {}]   ;;  %s2808_s6 = inlined_call_operand.vmem [shape: f32[1,32], index: 6, kind: input, shape index: {}]   ;;  %s2809_s7 = inlined_call_operand.vmem [shape: f32[1,32], index: 7, kind: input, shape index: {}]   ;;  %s2810_s8 = inlined_call_operand.vmem [shape: bf16[32,128], index: 8, kind: input, shape index: {}]   ;;  %s2811_s9 = inlined_call_operand.vmem [shape: f32[1,128], index: 9, kind: input, shape index: {}]   ;;  %s2812_s10 = inlined_call_operand.vmem [shape: bf16[128,32], index: 10, kind: input, shape index: {}]   ;;  %s2813_s11 = inlined_call_operand.vmem [shape: f32[1,32], index: 11, kind: input, shape index: {}]   ;;  %s2814_s12 = inlined_call_operand.hbm [shape: f32[2,8,32], index: 12, kind: output, shape index: {}, may-alias: {0,12}]  }
   0x1   :  { %19 = vsyncpa [#allocation3 + $0x1], 0 }
   0x2   :  { %20 = vsyncpa [#allocation4], 0 }
   0x3   :  { %22 = vsyncpa [#allocation4 + $0x1], 0  ;;  %s2378_s21 = smov 0   ;;  %s2380_s22 = smov 0  }
   0x4   :  { %s2382_s23 = smov 0   ;;  %s2384_s24 = smov 0  }
   0x5 LB: > { %2819 = sst [smem:[#allocation8_spill]] %s2290_s23  ;;  %s2399_s25 = sadd.s32 4294967295, %s2294_s24   ;;  %s2294_s24 = sphi %s2384_s24, %s2832_s24   ;;  %s2290_s23 = sphi %s2382_s23, %s2834_s23   ;;  %s2286_s22 = sphi %s2380_s22, %s2836_s22   ;;  %s2282_s21 = sphi %s2378_s21, %s2835_s21  }
   0x6   : > { %s1901_s26 = sadd.s32 4294967294, %s2294_s24   ;;  %s2403_s27 = sadd.s32 1, %s2294_s24  }
   0x7   : > { %2820 = sst [smem:[#allocation9_spill]] %s2403_s27  ;;  %s35_s28 = sadd.s32 1, %s2290_s23 }
   0x8   : > { %s32_s29 = ssub.s32 %s2294_s24, %s2403_s27  ;;  %p42_p0 = scmp.ne.s32.totalorder %s2290_s23, %s2286_s22 }
   0x9   : > { %p33_p1 = scmp.eq.s32.totalorder %s32_s29, 0  ;;  %p43_p2 = scmp.eq.s32.totalorder %s2294_s24, 0 }
   0xa   : > { %p48_p3 = scmp.ne.s32.totalorder %s2286_s22, %s2282_s21  ;;  %p49_p4 = scmp.eq.s32.totalorder %s2399_s25, 0 }
   0xb   : > { %s2415_s30 = scalar_select %p33_p1, %s2290_s23, %s35_s28  }
   0xc   : > { %p2417_p5 = por %p43_p2, %p42_p0  ;;  %p2421_p6 = por %p49_p4, %p48_p3 }
   0xd   : > { %2821 = sst [smem:[#allocation10_spill]] %s2415_s30  ;;  %p303_p7 = scmp.eq.s32.totalorder %s2399_s25, 1 }
   0xe   : > { %p309_p8 = scmp.eq.s32.totalorder %s1901_s26, 1  ;;  %p2115_p10 = scmp.lt.s32.totalorder %s2294_s24, 2 }
   0xf   : > { %p2428_p11 = por %p303_p7, %p42_p0  ;;  %s362_s17 = sand.u32 1, %s2290_s23  }
  0x10   : > { %p2432_p12 = por %p309_p8, %p48_p3  ;;  %s1905_s18 = sshll.u32 %s2294_s24, 7 }
  0x11   : > { %s2824_s15 = scalar_select %p2428_p11, 1, 0 }
  0x12   : > { %s2825_s16 = scalar_select %p2432_p12, 1, 0 }
  0x13   : > { %s1904_s19 = sshll.u32 %s362_s17, 3  ;;  %s2441_s29 = scalar_lea.hbm %s2802_s0, %s1905_s18 }
  0x14   : > { %s366_s26 = scalar_lea.vmem [#allocation2], %s1904_s19  ;;  %p2445_p13 = pnand %p2115_p10, %p2417_p5 }
  0x15   : > { %s373_s30 = sshll.u32 %s366_s26, 4  ;;  %s363_s20 = scalar_lea.sflag [#allocation3], %s362_s17  ;;  %s2449_s30 = int_to_ptr.vmem [resolvable:$true] %s373_s30 }
  0x16   : > { %s2198_s18 = scalar_lea.hbm %s2441_s29, 128  ;;  %p2200_p3 = pneg %p2445_p13 }
  0x17   : > { %p2199_p2 = scmp.ne.s32.totalorder %s2441_s29, %s2198_s18  ;;  %s2203_s28 = scalar_lea.hbm %s2802_s0, 256 }
  0x18   : > { %p2204_p5 = scmp.lt.u32.totalorder %s2441_s29, %s2802_s0  ;;  %p2205_p8 = scmp.lt.u32.totalorder %s2203_s28, %s2198_s18 }
  0x19   : > { %p2201_p4 = pnand %p2200_p3, %p2199_p2  ;;  %p2207_p9 = scmp.lt.u32.totalorder %s2198_s18, %s2441_s29 }
  0x1a   : > { %p2206_p10 = por %p2205_p8, %p2204_p5 }
  0x1b   : > { %p2202_p7 = pneg %p2201_p4 }
  0x1c   : > { %p2208_p0 = por %p2207_p9, %p2206_p10 }
  0x1e   : > { %p2209_p1 = pnand %p2208_p0, %p2202_p7 }
  0x20   : > { %2212 = shalt.err (!%p2209_p1)
}
  0x21   : > { %s2213_s17 = scalar_lea.vmem %s2449_s30, 128  ;;  %s2296_s13 = smov [#allocation2]  }
  0x22   : > { %p2214_p2 = scmp.ne.s32.totalorder %s2449_s30, %s2213_s17  ;;  %s2218_s19 = sshll.u32 %s2296_s13, 4  ;;  %s2219_s19 = int_to_ptr.vmem [resolvable:$false] %s2218_s19 }
  0x23   : > { %s2220_s23 = scalar_lea.vmem %s2219_s19, 256  ;;  %p2221_p11 = scmp.lt.s32.totalorder %s2449_s30, %s2219_s19 }
  0x24   : > { %p2216_p4 = pnand %p2214_p2, %p2200_p3  ;;  %p2222_p5 = scmp.lt.s32.totalorder %s2220_s23, %s2213_s17 }
  0x26   : > { %p2217_p12 = pneg %p2216_p4  ;;  %p2223_p8 = por %p2222_p5, %p2221_p11 }
  0x28   : > { %p2224_p9 = pnand %p2223_p8, %p2217_p12 }
  0x2a   : > { %2227 = shalt.err (!%p2224_p9)
}
  0x2b   : > { %2110 = dma.hbm_to_vmem [thread:$0]  (!%p2445_p13), %s2441_s29, 128, %s2449_s30, %s363_s20  }
  0x2c   : > { %p2827_p0 = scmp.lt.s32.totalorder %s2294_s24, 3  ;;  %p2828_p1 = scmp.ge.s32.totalorder %s2294_s24, 1 }
  0x2e   : > { %p379_p3 = pnand %p2828_p1, %p2827_p0 }
  0x2f   : > { %s2483_s18 = sand.u32 (!%p379_p3), 1, %s2286_s22  }
  0x30   : > { %382 = sbr.rel (%p379_p3) target bundleno = 2541 (0x9ed), region = 68  ;;  %s1907_s28 = sshll.u32 (!%p379_p3), %s2483_s18, 3 }
  0x31   : > { %s385_s26 = scalar_lea.sflag (!%p379_p3), [#allocation3], %s2483_s18  ;;  %s388_s27 = scalar_lea.vmem (!%p379_p3), [#allocation2], %s1907_s28 }
  0x37   : > { %2273 = dma.done.wait (%p2421_p6), %s385_s26, 128  }
  0x38   : > { %2275 = vsyncadd (%p2421_p6), %s385_s26, 4294967168  ;;  %vm431_vm0 = vcmask 261120   ;;  %v2493_v0 = vld [vmem:[%s388_s27] sm:$0xff]  ;;  %v2297_v8 = vmov 0.0   ;;  %vm2298_vm1 = vmmov 0   ;;  %s2299_s26 = smov 80   ;;  %v561_v26 = vlaneseq }
  0x39   : > { %v432_v1 = vsel %vm431_vm0, %v2493_v0, 0.0  ;;  %v2164_v7 = vld [vmem:[%s2805_s3] sm:$0xff]   ;;  %1995 = vmatprep.subr.bf16.mxu1 %v2297_v8  ;;  %1999 = vmatprep.mubr.msk.bf16.mxu1 %vm2298_vm1, %v2297_v8  ;;  %v2165_v9 = vld [vmem:[%s2805_s3 + $0x8] sm:$0xff]   ;;  %s2300_s27 = smov 96   ;;  %s2301_s30 = smov 88   ;;  %vm976_vm2 = vcmask 64512  }
  0x3a   : > { %433 = vadd.xlane.f32.xlu0 %v432_v1  ;;  %1996 = vmatpush3.bf16.msra.mxu1 %v2164_v7  ;;  %v1909_v14 = vld [vmem:[%s2803_s1] ss:$0 sm:$0xff]  ;;  %s2302_s29 = smov 72   ;;  %s2303_s14 = smov 120   ;;  %v2306_v24 = vmov 1983009808  }
  0x3b   : > { %2021 = vmatprep.subr.bf16.mxu0 %v2297_v8  ;;  %1997 = vmatprep.subr.bf16.mxu1 %v2297_v8  ;;  %v1910_v16 = vld [vmem:[%s2804_s2] ss:$0 sm:$0xff]  ;;  %s2304_s20 = smov 112   ;;  %s2305_s17 = smov 104   ;;  %v559_v25 = vunpack.c.l.s4 %v2306_v24  ;;  %v2307_v28 = vmov 1934713408  }
  0x3c   : > { %2023 = vmatprep.mubr.msk.bf16.mxu0 %vm2298_vm1, %v2297_v8  ;;  %v623_v29 = vunpack.c.l.s4 %v2307_v28  ;;  %v562_v31 = vshrl.u32 %v561_v26, 7  ;;  %s2308_s13 = smov 64   ;;  %s2309_s19 = smov 48   ;;  %vm1212_vm3 = vcmask 1043456  }
  0x3d   : > { %v560_v30 = vunpack.c.0.s8 %v559_v25  ;;  %s2310_s23 = smov 40   ;;  %p2829_p11 = scmp.ne.s32.totalorder %s2824_s15, 0 }
  0x3e   : > { %1998 = vmatpush3.bf16.msra.mxu1 %v2165_v9  ;;  %v624_v34 = vunpack.c.0.s8 %v623_v29 }
  0x3f   : > { %2003 = vmatprep.subr.bf16.mxu1 %v2297_v8  ;;  %v2531_v35 = vsub.s32 %v560_v30, %v562_v31 }
  0x40   : > { %v2533_v41 = vsub.s32 %v624_v34, %v562_v31 }
  0xc7   : > { %v434_v2 = vpop.xlane.xlu0 %433 }
  0xc8   : > { %v436_v3 = vmul.f32 0.03125, %v434_v2 }
  0xca   : > { %v437_v4 = vsub.f32 %v2493_v0, %v436_v3 }
  0xcc   : > { %v438_v5 = vmul.f32 %v437_v4, %v437_v4 }
  0xce   : > { %v439_v6 = vsel %vm431_vm0, %v438_v5, 0.0 }
  0xcf   : > { %440 = vadd.xlane.f32.xlu0 %v439_v6 }
 0x15c   : > { %v441_v10 = vpop.xlane.xlu0 %440 }
 0x15d   : > { %v442_v11 = vmul.f32 0.03125, %v441_v10 }
 0x15f   : > { %v443_v12 = vadd.f32 1e-05, %v442_v11 }
 0x161   : > { %2176 = vrsqrt.f32 %v443_v12 }
 0x16b   : > { %v2177_v13 = vpop.eup %2176 }
 0x16c   : > { %v445_v15 = vmul.f32 %v2177_v13, %v437_v4 }
 0x16e   : > { %v453_v17 = vmul.f32 %v1909_v14, %v445_v15 }
 0x170   : > { %v461_v18 = vadd.f32 %v1910_v16, %v453_v17 }
 0x172   : > { %v462_v19 = vpack.c.bf16 %v461_v18, %v461_v18 }
 0x174   : > { %2000 = vmatmul.mubr.msk.bf16.vlgmr.msra.gmra.mrb[0].mxu1 %vm431_vm0, %v462_v19 }
 0x175   : > { %2005 = vmatprep.mubr.msk.bf16.mxu1 %vm2298_vm1, %v2297_v8 }
 0x247   : > { %v2522_v20 = vpop.f32.mrb[0].mxu1 }
 0x248   : > { %538 = vrot.lane.b32.xlu0 %v2522_v20, %s2299_s26  ;;  %532 = vrot.lane.b32.xlu1 %v2522_v20, %s2300_s27  ;;  %v2001_v21 = vpop.f32.mrb[1].mxu1  ;;  %s2311_s26 = smov 56  }
 0x249   : > { %v519_v22 = vpop.f32.mrb[2].mxu1 }
 0x24a   : > { %v2002_v23 = vpop.f32.mrb[3].mxu1 }
 0x24c   : > { %535 = vrot.lane.b32.xlu1 %v2522_v20, %s2301_s30 }
 0x250   : > { %541 = vrot.lane.b32.xlu1 %v2522_v20, %s2302_s29 }
 0x254   : > { %523 = vrot.lane.b32.xlu1 %v2522_v20, %s2303_s14 }
 0x258   : > { %526 = vrot.lane.b32.xlu1 %v2522_v20, %s2304_s20  ;;  %s2312_s20 = smov [#allocation5]  }
 0x25c   : > { %529 = vrot.lane.b32.xlu1 %v2522_v20, %s2305_s17  ;;  %s2232_s17 = sshll.u32 %s2312_s20, 4  ;;  %s2233_s17 = int_to_ptr.vmem [resolvable:$false] %s2232_s17 }
 0x2ba   : > { %v533_v27 = vpop.permute.xlu1 %532  ;;  %v539_v32 = vpop.permute.xlu0 %538 }
 0x2bb   : > { %v588_v36 = vcombine.low %v533_v27, %v539_v32  ;;  %v589_v37 = vcombine.high %v533_v27, %v539_v32 }
 0x2bd   : > { %v596_v42 = vrot.slane %v588_v36, %v2531_v35  ;;  %v603_v43 = vrot.slane %v589_v37, %v2531_v35 }
 0x2be   : > { %v536_v33 = vpop.permute.xlu1 %535 }
 0x2c2   : > { %v542_v38 = vpop.permute.xlu1 %541 }
 0x2c3   : > { %v604_v39 = vcombine.low %v536_v33, %v542_v38  ;;  %v605_v40 = vcombine.high %v536_v33, %v542_v38 }
 0x2c5   : > { %v612_v44 = vrot.slane %v604_v39, %v2531_v35  ;;  %v619_v45 = vrot.slane %v605_v40, %v2531_v35 }
 0x2c6   : > { %v524_v46 = vpop.permute.xlu1 %523 }
 0x2c7   : > { %v652_v47 = vcombine.low %v596_v42, %v612_v44  ;;  %v653_v48 = vcombine.high %v596_v42, %v612_v44  ;;  %v668_v49 = vcombine.low %v603_v43, %v619_v45  ;;  %v669_v50 = vcombine.high %v603_v43, %v619_v45 }
 0x2c9   : > { %v660_v51 = vrot.slane %v652_v47, %v2533_v41  ;;  %v667_v52 = vrot.slane %v653_v48, %v2533_v41  ;;  %v676_v53 = vrot.slane %v668_v49, %v2533_v41  ;;  %v683_v54 = vrot.slane %v669_v50, %v2533_v41 }
 0x2ca   : > { %v527_v55 = vpop.permute.xlu1 %526 }
 0x2cb   : > { %v1915_v56 = vcombine.low %v660_v51, %v667_v52  ;;  %v1917_v57 = vcombine.high %v660_v51, %v667_v52  ;;  %v1919_v58 = vcombine.low %v676_v53, %v683_v54  ;;  %v1921_v59 = vcombine.high %v676_v53, %v683_v54 }
 0x2cc   : > { %v556_v60 = vcombine.low %v2522_v20, %v527_v55  ;;  %v557_v61 = vcombine.high %v2522_v20, %v527_v55 }
 0x2cd   : > { %v775_v62 = vrot.slane %v1915_v56, %v2531_v35  ;;  %v791_v63 = vrot.slane %v1917_v57, %v2531_v35  ;;  %v807_v1 = vrot.slane %v1919_v58, %v2531_v35  ;;  %v823_v2 = vrot.slane %v1921_v59, %v2531_v35 }
 0x2ce   : > { %v530_v3 = vpop.permute.xlu1 %529  ;;  %v564_v9 = vrot.slane %v556_v60, %v2531_v35  ;;  %v571_v10 = vrot.slane %v557_v61, %v2531_v35 }
 0x2cf   : > { %v572_v4 = vcombine.low %v524_v46, %v530_v3  ;;  %v573_v5 = vcombine.high %v524_v46, %v530_v3  ;;  %v840_v6 = vcombine.low %v775_v62, %v791_v63  ;;  %v872_v7 = vcombine.low %v807_v1, %v823_v2 }
 0x2d0   : > { %v841_v11 = vcombine.high %v775_v62, %v791_v63  ;;  %v873_v12 = vcombine.high %v807_v1, %v823_v2 }
 0x2d1   : > { %v580_v13 = vrot.slane %v572_v4, %v2531_v35  ;;  %v587_v14 = vrot.slane %v573_v5, %v2531_v35  ;;  %v848_v15 = vrot.slane %v840_v6, %v2533_v41  ;;  %v880_v16 = vrot.slane %v872_v7, %v2533_v41 }
 0x2d2   : > { %v855_v17 = vrot.slane %v841_v11, %v2533_v41  ;;  %v887_v18 = vrot.slane %v873_v12, %v2533_v41 }
 0x2d3   : > { %v620_v19 = vcombine.low %v564_v9, %v580_v13  ;;  %v621_v21 = vcombine.high %v564_v9, %v580_v13  ;;  %v636_v22 = vcombine.low %v571_v10, %v587_v14  ;;  %v637_v23 = vcombine.high %v571_v10, %v587_v14 }
 0x2d4   : > { %v892_v24 = vcombine.low %v848_v15, %v880_v16  ;;  %v895_v25 = vcombine.high %v855_v17, %v887_v18  ;;  %v893_v44 = vcombine.high %v848_v15, %v880_v16  ;;  %v894_v59 = vcombine.low %v855_v17, %v887_v18 }
 0x2d5   : > { %v628_v26 = vrot.slane %v620_v19, %v2533_v41  ;;  %v635_v27 = vrot.slane %v621_v21, %v2533_v41  ;;  %v644_v28 = vrot.slane %v636_v22, %v2533_v41  ;;  %v651_v29 = vrot.slane %v637_v23, %v2533_v41 }
 0x2d6   : > { %v968_v30 = vpack.c.bf16 %v892_v24, %v892_v24  ;;  %v971_v31 = vpack.c.bf16 %v895_v25, %v895_v25  ;;  %v969_v54 = vpack.c.bf16 %v893_v44, %v893_v44  ;;  %v970_v61 = vpack.c.bf16 %v894_v59, %v894_v59 }
 0x2d7   : > { %v1914_v32 = vcombine.low %v628_v26, %v635_v27  ;;  %v1916_v33 = vcombine.high %v628_v26, %v635_v27  ;;  %v1918_v34 = vcombine.low %v644_v28, %v651_v29  ;;  %v1920_v36 = vcombine.high %v644_v28, %v651_v29 }
 0x2d8   : > { %v981_v37 = vsel %vm976_vm2, %v968_v30, 0  ;;  %v1119_v38 = vsel %vm976_vm2, %v971_v31, 0  ;;  %v1027_v58 = vsel %vm976_vm2, %v969_v54, 0  ;;  %v1073_v63 = vsel %vm976_vm2, %v970_v61, 0 }
 0x2d9   : > { %v768_v39 = vrot.slane %v1914_v32, %v2531_v35  ;;  %v784_v40 = vrot.slane %v1916_v33, %v2531_v35  ;;  %v800_v42 = vrot.slane %v1918_v34, %v2531_v35  ;;  %v816_v43 = vrot.slane %v1920_v36, %v2531_v35  ;;  %2004 = vmatpush3.bf16.xpose.msra.mxu1 %v981_v37 }
 0x2da   : > { %2022 = vmatpush3.bf16.xpose.msra.mxu0 %v1119_v38  ;;  %2009 = vmatprep.subr.bf16.mxu1 %v2297_v8 }
 0x2db   : > { %v824_v45 = vcombine.low %v768_v39, %v784_v40  ;;  %v856_v46 = vcombine.low %v800_v42, %v816_v43  ;;  %v825_v47 = vcombine.high %v768_v39, %v784_v40  ;;  %v857_v48 = vcombine.high %v800_v42, %v816_v43  ;;  %2033 = vmatprep.subr.bf16.mxu0 %v2297_v8 }
 0x2dd   : > { %v832_v49 = vrot.slane %v824_v45, %v2533_v41  ;;  %v864_v50 = vrot.slane %v856_v46, %v2533_v41  ;;  %v839_v51 = vrot.slane %v825_v47, %v2533_v41  ;;  %v871_v52 = vrot.slane %v857_v48, %v2533_v41 }
 0x2df   : > { %v888_v53 = vcombine.low %v832_v49, %v864_v50  ;;  %v891_v55 = vcombine.high %v839_v51, %v871_v52  ;;  %v889_v60 = vcombine.high %v832_v49, %v864_v50  ;;  %v890_v1 = vcombine.low %v839_v51, %v871_v52 }
 0x2e1   : > { %v964_v56 = vpack.c.bf16 %v888_v53, %v888_v53  ;;  %v967_v57 = vpack.c.bf16 %v891_v55, %v891_v55  ;;  %v965_v62 = vpack.c.bf16 %v889_v60, %v889_v60  ;;  %v966_v2 = vpack.c.bf16 %v890_v1, %v890_v1 }
 0x2e3   : > { %2006 = vmatmul.mubr.msk.bf16.vlgmr.msra.gmra.mrb[4].mxu1 %vm976_vm2, %v964_v56  ;;  %2024 = vmatmul.mubr.msk.bf16.vlgmr.msra.gmra.mrb[0].mxu0 %vm976_vm2, %v967_v57 }
 0x2e4   : > { %2010 = vmatpush3.bf16.xpose.msra.mxu1 %v1027_v58  ;;  %2011 = vmatprep.mubr.msk.bf16.mxu1 %vm2298_vm1, %v2297_v8 }
 0x2e5   : > { %2015 = vmatprep.subr.bf16.mxu1 %v2297_v8  ;;  %2035 = vmatprep.mubr.msk.bf16.mxu0 %vm2298_vm1, %v2297_v8 }
 0x2eb   : > { %2012 = vmatmul.mubr.msk.bf16.vlgmr.msra.gmra.mrb[8].mxu1 %vm976_vm2, %v965_v62 }
 0x2ec   : > { %2016 = vmatpush3.bf16.xpose.msra.mxu1 %v1073_v63  ;;  %2017 = vmatprep.mubr.msk.bf16.mxu1 %vm2298_vm1, %v2297_v8 }
 0x2ed   : > { %2027 = vmatprep.subr.bf16.mxu1 %v2297_v8 }
 0x2f3   : > { %2018 = vmatmul.mubr.msk.bf16.vlgmr.msra.gmra.mrb[12].mxu1 %vm976_vm2, %v966_v2 }
 0x2f4   : > { %2029 = vmatprep.mubr.msk.bf16.mxu1 %vm2298_vm1, %v2297_v8 }
 0x3b6   : > { %v1017_v3 = vpop.f32.mrb[4].mxu1  ;;  %v1155_v4 = vpop.f32.mrb[0].mxu0 }
 0x3b7   : > { %v2007_v5 = vpop.f32.mrb[5].mxu1  ;;  %v2025_v6 = vpop.f32.mrb[1].mxu0  ;;  %v1161_v7 = vsel %vm976_vm2, %v1017_v3, -inf  ;;  %v1170_v18 = vsel %vm976_vm2, %v1155_v4, -inf }
 0x3b8   : > { %v1158_v9 = vpop.f32.mrb[2].mxu0  ;;  %1162 = vmax.xlane.f32.xlu1 %v1161_v7  ;;  %v1020_v10 = vpop.f32.mrb[6].mxu1 }
 0x3b9   : > { %v2008_v11 = vpop.f32.mrb[7].mxu1  ;;  %v2026_v12 = vpop.f32.mrb[3].mxu0 }
 0x3be   : > { %v1063_v13 = vpop.f32.mrb[8].mxu1 }
 0x3bf   : > { %v2013_v14 = vpop.f32.mrb[9].mxu1  ;;  %v1164_v15 = vsel %vm976_vm2, %v1063_v13, -inf }
 0x3c0   : > { %1165 = vmax.xlane.f32.xlu0 %v1164_v15  ;;  %v1066_v16 = vpop.f32.mrb[10].mxu1 }
 0x3c1   : > { %v2014_v17 = vpop.f32.mrb[11].mxu1 }
 0x3c4   : > { %1171 = vmax.xlane.f32.xlu0 %v1170_v18 }
 0x3c6   : > { %v1109_v19 = vpop.f32.mrb[12].mxu1 }
 0x3c7   : > { %v2019_v21 = vpop.f32.mrb[13].mxu1  ;;  %v1167_v22 = vsel %vm976_vm2, %v1109_v19, -inf }
 0x3c8   : > { %1168 = vmax.xlane.f32.xlu1 %v1167_v22  ;;  %v1112_v23 = vpop.f32.mrb[14].mxu1 }
 0x3c9   : > { %v2020_v24 = vpop.f32.mrb[15].mxu1 }
 0x3d9   : > { %544 = vrot.lane.b32.xlu1 %v2522_v20, %s2308_s13  ;;  %s2234_s13 = scalar_lea.vmem %s2233_s17, 256 }
 0x445   : > { %v1163_v25 = vpop.xlane.xlu1 %1162 }
 0x446   : > { %v1173_v26 = vsub.f32 %v1017_v3, %v1163_v25 }
 0x448   : > { %v1177_v27 = vmul.f32 1.442695, %v1173_v26 }
 0x44a   : > { %2178 = vpow2.f32 %v1177_v27 }
 0x44d   : > { %v1166_v28 = vpop.xlane.xlu0 %1165 }
 0x44e   : > { %v1174_v29 = vsub.f32 %v1063_v13, %v1166_v28 }
 0x450   : > { %v1179_v30 = vmul.f32 1.442695, %v1174_v29 }
 0x451   : > { %v1172_v36 = vpop.xlane.xlu0 %1171 }
 0x452   : > { %2180 = vpow2.f32 %v1179_v30  ;;  %v1176_v37 = vsub.f32 %v1155_v4, %v1172_v36 }
 0x454   : > { %v2594_v31 = vpop.eup %2178  ;;  %v1183_v39 = vmul.f32 1.442695, %v1176_v37 }
 0x455   : > { %v1185_v32 = vsel %vm976_vm2, %v2594_v31, 0.0  ;;  %v1169_v38 = vpop.xlane.xlu1 %1168 }
 0x456   : > { %1186 = vadd.xlane.f32.xlu1 %v1185_v32  ;;  %v1175_v40 = vsub.f32 %v1109_v19, %v1169_v38  ;;  %2182 = vpow2.f32 %v1183_v39 }
 0x458   : > { %v1181_v42 = vmul.f32 1.442695, %v1175_v40 }
 0x45a   : > { %2184 = vpow2.f32 %v1181_v42 }
 0x45c   : > { %v2598_v33 = vpop.eup %2180 }
 0x45d   : > { %v1188_v34 = vsel %vm976_vm2, %v2598_v33, 0.0 }
 0x45e   : > { %1189 = vadd.xlane.f32.xlu0 %v1188_v34 }
 0x460   : > { %v2605_v43 = vpop.eup %2182 }
 0x461   : > { %v1194_v44 = vsel %vm976_vm2, %v2605_v43, 0.0 }
 0x464   : > { %v2609_v45 = vpop.eup %2184 }
 0x465   : > { %v1191_v46 = vsel %vm976_vm2, %v2609_v45, 0.0 }
 0x467   : > { %550 = vrot.lane.b32.xlu1 %v2522_v20, %s2309_s19 }
 0x46b   : > { %553 = vrot.lane.b32.xlu1 %v2522_v20, %s2310_s23  ;;  %s1953_s23 = sshll.u32 %s2399_s25, 7  ;;  %s1818_s25 = scalar_lea.sflag [#allocation4], %s2483_s18 }
 0x46c   : > { %s2757_s14 = scalar_lea.hbm %s2814_s12, %s1953_s23 }
 0x474   : > { %547 = vrot.lane.b32.xlu0 %v2522_v20, %s2311_s26  ;;  %v545_v20 = vpop.permute.xlu1 %544  ;;  %s428_s26 = scalar_lea.vmem [#allocation5], %s1907_s28 }
 0x475   : > { %s1831_s27 = sshll.u32 %s428_s26, 4  ;;  %s2759_s27 = int_to_ptr.vmem [resolvable:$true] %s1831_s27 }
 0x476   : > { %s2228_s28 = scalar_lea.vmem %s2759_s27, 128  ;;  %p2235_p7 = scmp.lt.s32.totalorder %s2759_s27, %s2233_s17 }
 0x477   : > { %p2229_p6 = scmp.ne.s32.totalorder %s2759_s27, %s2228_s28  ;;  %p2236_p10 = scmp.lt.s32.totalorder %s2234_s13, %s2228_s28 }
 0x479   : > { %p2230_p12 = pnand %p2229_p6, %p2829_p11  ;;  %p2237_p2 = por %p2236_p10, %p2235_p7 }
 0x47b   : > { %p2231_p13 = pneg %p2230_p12 }
 0x47d   : > { %p2238_p4 = pnand %p2237_p2, %p2231_p13 }
 0x48f   : > { %1195 = vadd.xlane.f32.xlu1 %v1194_v44 }
 0x493   : > { %1192 = vadd.xlane.f32.xlu0 %v1191_v46 }
 0x4e3   : > { %v1187_v47 = vpop.xlane.xlu1 %1186 }
 0x4e4   : > { %2186 = vrcp.f32 %v1187_v47 }
 0x4e7   : > { %v551_v48 = vpop.permute.xlu1 %550 }
 0x4e8   : > { %v692_v50 = vcombine.low %v545_v20, %v551_v48  ;;  %v693_v51 = vcombine.high %v545_v20, %v551_v48 }
 0x4ea   : > { %v700_v56 = vrot.slane %v692_v50, %v2531_v35  ;;  %v707_v57 = vrot.slane %v693_v51, %v2531_v35  ;;  %v1398_v50 = vld [vmem:[%s2806_s4] sm:$0xf] }
 0x4eb   : > { %v1190_v49 = vpop.xlane.xlu0 %1189  ;;  %v554_v52 = vpop.permute.xlu1 %553 }
 0x4ec   : > { %2188 = vrcp.f32 %v1190_v49 }
 0x4ee   : > { %v2187_v18 = vpop.eup %2186 }
 0x4ef   : > { %v548_v53 = vpop.permute.xlu0 %547 }
 0x4f0   : > { %v708_v54 = vcombine.low %v548_v53, %v554_v52  ;;  %v709_v55 = vcombine.high %v548_v53, %v554_v52  ;;  %v1400_v52 = vld [vmem:[%s2806_s4 + $0x8] sm:$0xf]  ;;  %v1401_v53 = vld [vmem:[%s2806_s4 + $0xc] sm:$0xf] }
 0x4f2   : > { %v716_v58 = vrot.slane %v708_v54, %v2531_v35  ;;  %v723_v59 = vrot.slane %v709_v55, %v2531_v35 }
 0x4f4   : > { %v724_v60 = vcombine.low %v700_v56, %v716_v58  ;;  %v725_v61 = vcombine.high %v700_v56, %v716_v58  ;;  %v740_v62 = vcombine.low %v707_v57, %v723_v59  ;;  %v741_v63 = vcombine.high %v707_v57, %v723_v59 }
 0x4f6   : > { %v732_v1 = vrot.slane %v724_v60, %v2533_v41  ;;  %v739_v2 = vrot.slane %v725_v61, %v2533_v41  ;;  %v748_v3 = vrot.slane %v740_v62, %v2533_v41  ;;  %v755_v4 = vrot.slane %v741_v63, %v2533_v41  ;;  %v2189_v24 = vpop.eup %2188 }
 0x4f7   : > { %v1202_v29 = vmul.f32 %v2189_v24, %v2598_v33  ;;  %v1498_v60 = vsel %vm1212_vm3, %v1400_v52, 0  ;;  %v1544_v61 = vsel %vm1212_vm3, %v1401_v53, 0 }
 0x4f8   : > { %v896_v5 = vcombine.low %v732_v1, %v739_v2  ;;  %v1922_v6 = vcombine.high %v732_v1, %v739_v2  ;;  %v912_v7 = vcombine.low %v748_v3, %v755_v4  ;;  %v1923_v9 = vcombine.high %v748_v3, %v755_v4 }
 0x4f9   : > { %v1206_v39 = vpack.c.bf16 %v1202_v29, %v1202_v29 }
 0x4fa   : > { %v903_v10 = vrot.slane %v896_v5, %v2531_v35  ;;  %v911_v11 = vrot.slane %v1922_v6, %v2531_v35  ;;  %v919_v12 = vrot.slane %v912_v7, %v2531_v35  ;;  %v927_v13 = vrot.slane %v1923_v9, %v2531_v35 }
 0x4fb   : > { %v1201_v35 = vmul.f32 %v2187_v18, %v2594_v31 }
 0x4fc   : > { %v928_v14 = vcombine.low %v903_v10, %v911_v11  ;;  %v944_v15 = vcombine.low %v919_v12, %v927_v13  ;;  %v929_v16 = vcombine.high %v903_v10, %v911_v11  ;;  %v945_v17 = vcombine.high %v919_v12, %v927_v13 }
 0x4fe   : > { %v936_v19 = vrot.slane %v928_v14, %v2533_v41  ;;  %v952_v21 = vrot.slane %v944_v15, %v2533_v41  ;;  %v943_v22 = vrot.slane %v929_v16, %v2533_v41  ;;  %v959_v23 = vrot.slane %v945_v17, %v2533_v41 }
 0x4ff   : > { %v1205_v41 = vpack.c.bf16 %v1201_v35, %v1201_v35 }
 0x500   : > { %v960_v25 = vcombine.low %v936_v19, %v952_v21  ;;  %v961_v26 = vcombine.high %v936_v19, %v952_v21  ;;  %v962_v27 = vcombine.low %v943_v22, %v959_v23  ;;  %v963_v28 = vcombine.high %v943_v22, %v959_v23 }
 0x502   : > { %v972_v30 = vpack.c.bf16 %v960_v25, %v960_v25  ;;  %v973_v32 = vpack.c.bf16 %v961_v26, %v961_v26  ;;  %v974_v37 = vpack.c.bf16 %v962_v27, %v962_v27  ;;  %v975_v38 = vpack.c.bf16 %v963_v28, %v963_v28 }
 0x504   : > { %v1214_v34 = vsel %vm1212_vm3, %v972_v30, 0  ;;  %v1260_v36 = vsel %vm1212_vm3, %v973_v32, 0  ;;  %v1306_v31 = vsel %vm1212_vm3, %v974_v37, 0  ;;  %v1352_v33 = vsel %vm1212_vm3, %v975_v38, 0  ;;  %v1936_v38 = vld [vmem:[%s2807_s5] ss:$0 sm:$0xff] }
 0x505   : > { %2028 = vmatpush3.bf16.msra.mxu1 %v1214_v34  ;;  %2034 = vmatpush3.bf16.msra.mxu0 %v1260_v36 }
 0x506   : > { %2039 = vmatprep.subr.bf16.mxu1 %v2297_v8  ;;  %2045 = vmatprep.subr.bf16.mxu0 %v2297_v8 }
 0x508   : > { %2030 = vmatmul.mubr.msk.bf16.vlgmr.msra.gmra.mrb[16].mxu1 %vm976_vm2, %v1205_v41  ;;  %2036 = vmatmul.mubr.msk.bf16.vlgmr.msra.gmra.mrb[4].mxu0 %vm976_vm2, %v1206_v39 }
 0x509   : > { %2040 = vmatpush3.bf16.msra.mxu1 %v1306_v31  ;;  %2046 = vmatpush3.bf16.msra.mxu0 %v1352_v33 }
 0x50a   : > { %2047 = vmatprep.mubr.msk.bf16.mxu0 %vm2298_vm1, %v2297_v8  ;;  %2041 = vmatprep.mubr.msk.bf16.mxu1 %vm2298_vm1, %v2297_v8 }
 0x50b   : > { %2051 = vmatprep.subr.bf16.mxu1 %v2297_v8  ;;  %2057 = vmatprep.subr.bf16.mxu0 %v2297_v8 }
 0x51c   : > { %v1196_v40 = vpop.xlane.xlu1 %1195 }
 0x51d   : > { %2190 = vrcp.f32 %v1196_v40 }
 0x520   : > { %v1193_v42 = vpop.xlane.xlu0 %1192 }
 0x521   : > { %2192 = vrcp.f32 %v1193_v42 }
 0x527   : > { %v2191_v44 = vpop.eup %2190 }
 0x528   : > { %v1204_v46 = vmul.f32 %v2191_v44, %v2605_v43  ;;  %v1399_v43 = vld [vmem:[%s2806_s4 + $0x4] sm:$0xf] }
 0x529   : > { %v1452_v51 = vsel %vm1212_vm3, %v1399_v43, 0  ;;  %v2170_v43 = vld [vmem:[%s2812_s10 + $0x10] sm:$0xff]  }
 0x52a   : > { %v1208_v20 = vpack.c.bf16 %v1204_v46, %v1204_v46 }
 0x52b   : > { %v2193_v47 = vpop.eup %2192 }
 0x52c   : > { %v1203_v48 = vmul.f32 %v2193_v47, %v2609_v45  ;;  %2048 = vmatmul.mubr.msk.bf16.vlgmr.msra.gmra.mrb[8].mxu0 %vm976_vm2, %v1208_v20  ;;  %v1406_v45 = vsel %vm1212_vm3, %v1398_v50, 0  ;;  %v2169_v50 = vld [vmem:[%s2812_s10 + $0x8] sm:$0xff]  }
 0x52d   : > { %2059 = vmatprep.mubr.msk.bf16.mxu0 %vm2298_vm1, %v2297_v8  ;;  %2058 = vmatpush3.bf16.msra.mxu0 %v1452_v51 }
 0x52e   : > { %v1207_v49 = vpack.c.bf16 %v1203_v48, %v1203_v48  ;;  %2069 = vmatprep.subr.bf16.mxu0 %v2297_v8  ;;  %v2166_v48 = vld [vmem:[%s2810_s8] sm:$0xff]  }
 0x530   : > { %2042 = vmatmul.mubr.msk.bf16.vlgmr.msra.gmra.mrb[20].mxu1 %vm976_vm2, %v1207_v49  ;;  %v2168_v49 = vld [vmem:[%s2812_s10] sm:$0xff]  }
 0x531   : > { %2053 = vmatprep.mubr.msk.bf16.mxu1 %vm2298_vm1, %v2297_v8  ;;  %2052 = vmatpush3.bf16.msra.mxu1 %v1406_v45 }
 0x532   : > { %2063 = vmatprep.subr.bf16.mxu1 %v2297_v8 }
 0x5db   : > { %v1250_v54 = vpop.f32.mrb[16].mxu1  ;;  %v1296_v55 = vpop.f32.mrb[4].mxu0 }
 0x5dc   : > { %v1394_v56 = vpack.c.bf16 %v1250_v54, %v1250_v54  ;;  %v1395_v57 = vpack.c.bf16 %v1296_v55, %v1296_v55  ;;  %v2031_v58 = vpop.f32.mrb[17].mxu1  ;;  %v2037_v59 = vpop.f32.mrb[5].mxu0  ;;  %v1937_v54 = vld [vmem:[%s2808_s6] ss:$0 sm:$0xff] }
 0x5dd   : > { %v1253_v62 = vpop.f32.mrb[18].mxu1  ;;  %v1299_v63 = vpop.f32.mrb[6].mxu0 }
 0x5de   : > { %v2032_v1 = vpop.f32.mrb[19].mxu1  ;;  %v2038_v2 = vpop.f32.mrb[7].mxu0  ;;  %2054 = vmatmul.mubr.msk.bf16.vlgmr.msra.gmra.mrb[24].mxu1 %vm976_vm2, %v1394_v56  ;;  %2060 = vmatmul.mubr.msk.bf16.vlgmr.msra.gmra.mrb[12].mxu0 %vm976_vm2, %v1395_v57  ;;  %v1938_v56 = vld [vmem:[%s2809_s7] ss:$0 sm:$0xff]  ;;  %v2173_v62 = vld [vmem:[%s2812_s10 + $0x28] sm:$0xff]   ;;  %v2174_v63 = vld [vmem:[%s2812_s10 + $0x30] sm:$0xff]  }
 0x5df   : > { %2064 = vmatpush3.bf16.msra.mxu1 %v1498_v60  ;;  %2070 = vmatpush3.bf16.msra.mxu0 %v1544_v61  ;;  %v2171_v60 = vld [vmem:[%s2812_s10 + $0x18] sm:$0xff]   ;;  %v2172_v61 = vld [vmem:[%s2812_s10 + $0x20] sm:$0xff]  }
 0x5e0   : > { %2071 = vmatprep.mubr.msk.bf16.mxu0 %vm2298_vm1, %v2297_v8  ;;  %2065 = vmatprep.mubr.msk.bf16.mxu1 %vm2298_vm1, %v2297_v8  ;;  %v2175_v1 = vld [vmem:[%s2812_s10 + $0x38] sm:$0xff]   ;;  %v1939_v2 = vld [vmem:[%s2811_s9] ss:$0 sm:$0xff] }
 0x5e1   : > { %2075 = vmatprep.subr.bf16.mxu1 %v2297_v8  ;;  %2083 = vmatprep.subr.bf16.mxu0 %v2297_v8 }
 0x5ff   : > { %v1388_v3 = vpop.f32.mrb[8].mxu0 }
 0x600   : > { %v1397_v4 = vpack.c.bf16 %v1388_v3, %v1388_v3  ;;  %v2049_v5 = vpop.f32.mrb[9].mxu0 }
 0x601   : > { %v1391_v6 = vpop.f32.mrb[10].mxu0 }
 0x602   : > { %v2050_v7 = vpop.f32.mrb[11].mxu0  ;;  %2072 = vmatmul.mubr.msk.bf16.vlgmr.msra.gmra.mrb[16].mxu0 %vm976_vm2, %v1397_v4 }
 0x603   : > { %v1342_v9 = vpop.f32.mrb[20].mxu1  ;;  %2099 = vmatprep.mubr.msk.bf16.mxu0 %vm2298_vm1, %v2297_v8  ;;  %2084 = vmatpush3.bf16.msra.mxu0 %v2168_v49 }
 0x604   : > { %v1396_v10 = vpack.c.bf16 %v1342_v9, %v1342_v9  ;;  %v2043_v11 = vpop.f32.mrb[21].mxu1  ;;  %2085 = vmatprep.subr.bf16.mxu0 %v2297_v8 }
 0x605   : > { %v1345_v12 = vpop.f32.mrb[22].mxu1 }
 0x606   : > { %v2044_v13 = vpop.f32.mrb[23].mxu1  ;;  %2066 = vmatmul.mubr.msk.bf16.vlgmr.msra.gmra.mrb[28].mxu1 %vm976_vm2, %v1396_v10 }
 0x607   : > { %2079 = vmatprep.mubr.msk.bf16.mxu1 %vm2298_vm1, %v2297_v8  ;;  %2076 = vmatpush3.bf16.msra.mxu1 %v2166_v48 }
 0x608   : > { %2077 = vmatprep.subr.bf16.mxu1 %v2297_v8  ;;  %2086 = vmatpush3.bf16.msra.mxu0 %v2169_v50 }
 0x609   : > { %2087 = vmatprep.subr.bf16.mxu0 %v2297_v8 }
 0x60c   : > { %2088 = vmatpush3.bf16.msra.mxu0 %v2170_v43 }
 0x60d   : > { %2089 = vmatprep.subr.bf16.mxu0 %v2297_v8 }
 0x610   : > { %2090 = vmatpush3.bf16.msra.mxu0 %v2171_v60 }
 0x611   : > { %2091 = vmatprep.subr.bf16.mxu0 %v2297_v8 }
 0x614   : > { %2092 = vmatpush3.bf16.msra.mxu0 %v2172_v61 }
 0x615   : > { %2093 = vmatprep.subr.bf16.mxu0 %v2297_v8 }
 0x618   : > { %2094 = vmatpush3.bf16.msra.mxu0 %v2173_v62 }
 0x619   : > { %2095 = vmatprep.subr.bf16.mxu0 %v2297_v8 }
 0x61c   : > { %2096 = vmatpush3.bf16.msra.mxu0 %v2174_v63 }
 0x61d   : > { %2097 = vmatprep.subr.bf16.mxu0 %v2297_v8 }
 0x620   : > { %2098 = vmatpush3.bf16.msra.mxu0 %v2175_v1 }
 0x6b1   : > { %v1442_v14 = vpop.f32.mrb[24].mxu1  ;;  %v1488_v15 = vpop.f32.mrb[12].mxu0 }
 0x6b2   : > { %v1586_v16 = vsel %vm431_vm0, %v1442_v14, 0.0  ;;  %v1587_v17 = vsel %vm431_vm0, %v1488_v15, 0.0  ;;  %v2055_v18 = vpop.f32.mrb[25].mxu1  ;;  %v2061_v19 = vpop.f32.mrb[13].mxu0  ;;  %v1943_v14 = vld [vmem:[%s2813_s11] ss:$0 sm:$0xff] }
 0x6b3   : > { %v1588_v21 = vadd.f32 %v1587_v17, %v1586_v16  ;;  %v1445_v22 = vpop.f32.mrb[26].mxu1  ;;  %v1491_v23 = vpop.f32.mrb[14].mxu0 }
 0x6b4   : > { %v2056_v24 = vpop.f32.mrb[27].mxu1  ;;  %v2062_v25 = vpop.f32.mrb[15].mxu0 }
 0x6d5   : > { %v1580_v26 = vpop.f32.mrb[16].mxu0 }
 0x6d6   : > { %v2073_v27 = vpop.f32.mrb[17].mxu0  ;;  %v1591_v37 = vsel %vm431_vm0, %v1580_v26, 0.0 }
 0x6d7   : > { %v1583_v28 = vpop.f32.mrb[18].mxu0 }
 0x6d8   : > { %v2074_v35 = vpop.f32.mrb[19].mxu0 }
 0x6d9   : > { %v1534_v29 = vpop.f32.mrb[28].mxu1 }
 0x6da   : > { %v1589_v30 = vsel %vm431_vm0, %v1534_v29, 0.0  ;;  %v2067_v32 = vpop.f32.mrb[29].mxu1 }
 0x6db   : > { %v1590_v34 = vadd.f32 %v1589_v30, %v1588_v21  ;;  %v1537_v36 = vpop.f32.mrb[30].mxu1 }
 0x6dc   : > { %v2068_v41 = vpop.f32.mrb[31].mxu1 }
 0x6dd   : > { %v1592_v39 = vadd.f32 %v1591_v37, %v1590_v34 }
 0x6df   : > { %v1600_v31 = vadd.f32 %v1936_v38, %v1592_v39 }
 0x6e1   : > { %v2693_v33 = vadd.f32 %v1600_v31, %v2493_v0  ;;  %v2167_v0 = vld [vmem:[%s2810_s8 + $0x8] sm:$0xff]  }
 0x6e2   : > { %2078 = vmatpush3.bf16.msra.mxu1 %v2167_v0 }
 0x6e3   : > { %v1602_v40 = vsel %vm431_vm0, %v2693_v33, 0.0 }
 0x6e4   : > { %1603 = vadd.xlane.f32.xlu0 %v1602_v40 }
 0x771   : > { %v1604_v42 = vpop.xlane.xlu0 %1603 }
 0x772   : > { %v1605_v44 = vmul.f32 0.03125, %v1604_v42 }
 0x774   : > { %v1606_v46 = vsub.f32 %v2693_v33, %v1605_v44 }
 0x776   : > { %v1607_v20 = vmul.f32 %v1606_v46, %v1606_v46 }
 0x778   : > { %v1608_v47 = vsel %vm431_vm0, %v1607_v20, 0.0 }
 0x779   : > { %1609 = vadd.xlane.f32.xlu0 %v1608_v47 }
 0x806   : > { %v1610_v45 = vpop.xlane.xlu0 %1609 }
 0x807   : > { %v1611_v51 = vmul.f32 0.03125, %v1610_v45 }
 0x809   : > { %v1612_v52 = vadd.f32 1e-05, %v1611_v51 }
 0x80b   : > { %2194 = vrsqrt.f32 %v1612_v52 }
 0x815   : > { %v2195_v53 = vpop.eup %2194 }
 0x816   : > { %v1614_v55 = vmul.f32 %v2195_v53, %v1606_v46 }
 0x818   : > { %v1622_v57 = vmul.f32 %v1937_v54, %v1614_v55 }
 0x81a   : > { %v1630_v58 = vadd.f32 %v1938_v56, %v1622_v57 }
 0x81c   : > { %v1631_v59 = vpack.c.bf16 %v1630_v58, %v1630_v58 }
 0x81e   : > { %2080 = vmatmul.mubr.msk.bf16.vlgmr.msra.gmra.mrb[32].mxu1 %vm431_vm0, %v1631_v59 }
 0x8f1   : > { %v1692_v3 = vpop.f32.mrb[32].mxu1 }
 0x8f2   : > { %v1693_v4 = vadd.f32 %v1939_v2, %v1692_v3  ;;  %v2081_v5 = vpop.f32.mrb[33].mxu1 }
 0x8f3   : > { %v1695_v6 = vpop.f32.mrb[34].mxu1 }
 0x8f4   : > { %v1699_v7 = vmul.f32 0.70710677, %v1693_v4  ;;  %v2082_v9 = vpop.f32.mrb[35].mxu1  ;;  %v1698_v8 = vmul.f32 0.5, %v1693_v4 }
 0x8f6   : > { %2196 = verf.f32 %v1699_v7 }
 0x900   : > { %v2197_v10 = vpop.eup %2196 }
 0x901   : > { %v1701_v11 = vadd.f32 1.0, %v2197_v10 }
 0x903   : > { %v1702_v12 = vmul.f32 %v1701_v11, %v1698_v8 }
 0x905   : > { %v1703_v13 = vpack.c.bf16 %v1702_v12, %v1702_v12 }
 0x907   : > { %2100 = vmatmul.mubr.bf16.vlgmr.msra.gmra.mrb[20].mxu0 %v1703_v13 }
 0x9da   : > { %v1809_v15 = vpop.f32.mrb[20].mxu0 }
 0x9db   : > { %v1810_v16 = vadd.f32 %v1943_v14, %v1809_v15  ;;  %v2101_v17 = vpop.f32.mrb[21].mxu0 }
 0x9dc   : > { %v1812_v18 = vpop.f32.mrb[22].mxu0 }
 0x9dd   : > { %v1815_v19 = vadd.f32 %v1810_v16, %v2693_v33  ;;  %v2102_v21 = vpop.f32.mrb[23].mxu0 }
 0x9df   : > { %1816 = vst.msk [vmem:[%s428_s26] sm:$0xff] %vm431_vm0, %v1815_v19 }
 0x9e0   : > { %2241 = shalt.err (!%p2238_p4)
}
 0x9e1   : > { %s2242_s18 = scalar_lea.hbm %s2757_s14, 128  ;;  %s2246_s26 = scalar_lea.hbm %s2814_s12, 256 }
 0x9e2   : > { %p2243_p5 = scmp.ne.s32.totalorder %s2757_s14, %s2242_s18  ;;  %p2247_p0 = scmp.lt.u32.totalorder %s2757_s14, %s2814_s12 }
 0x9e3   : > { %p2248_p1 = scmp.lt.u32.totalorder %s2246_s26, %s2242_s18  ;;  %p2250_p6 = scmp.lt.u32.totalorder %s2242_s18, %s2757_s14 }
 0x9e4   : > { %p2244_p8 = pnand %p2243_p5, %p2829_p11 }
 0x9e5   : > { %p2249_p3 = por %p2248_p1, %p2247_p0 }
 0x9e6   : > { %p2245_p9 = pneg %p2244_p8 }
 0x9e7   : > { %p2251_p12 = por %p2250_p6, %p2249_p3 }
 0x9e9   : > { %p2252_p13 = pnand %p2251_p12, %p2245_p9 }
 0x9eb   : > { %2255 = shalt.err (!%p2252_p13)
}
 0x9ec   : > { %2105 = dma.vmem_to_hbm [thread:$0]  (%p2829_p11), %s2759_s27, 128, %s2757_s14, %s1818_s25  }
 0x9ed PF: > { %s1843_s28 = sand.u32 1, %s2282_s21   ;;  %p2830_p7 = scmp.ne.s32.totalorder %s2825_s16, 0 }
 0x9ee   : > { %p2831_p10 = scmp.ge.s32.totalorder %s2294_s24, 2  ;;  %s1844_s20 = scalar_lea.sflag [#allocation4], %s1843_s28 }
 0x9f0   : > { %p2112_p2 = pnand %p2831_p10, %p2830_p7 }
 0x9f2   : > { %2277 = dma.done.wait (!%p2112_p2), %s1844_s20, 128  }
 0x9f3   : > { %2279 = vsyncadd (!%p2112_p2), %s1844_s20, 4294967168  ;;  %s2832_s24 = sld [smem:[#allocation9_spill]]  ;;  %s2833_s17 = sld [smem:[#allocation8_spill]] }
 0x9f4   : > { %s2834_s23 = sld [smem:[#allocation10_spill]]  ;;  %s2835_s21 = smov %s2286_s22 }
 0x9f9   : > { %p25_p4 = scmp.ge.s32.totalorder %s2832_s24, 4   ;;  %s2836_s22 = smov %s2833_s17 }
 0x9fb   :  { %27 = sbr.rel (!%p25_p4) target bundleno = 5 (0x5), region = 113 }
 0xa02   :  { %1849 = vsyncpa [#allocation3], 1 }
 0xa03   :  { %1851 = vsyncpa [#allocation3 + $0x1], 1 }
 0xa04   :  { %1852 = vsyncpa [#allocation4], 1 }
 0xa05   :  { %1854 = vsyncpa [#allocation4 + $0x1], 1 }

</bundles_post_ra>
